<compile_context>
chip_gen: v7x
topology: tpu7x:2x2x1
jax: 0.10.0
libtpu: 0.0.40
codegen_flags: <defaults>
</compile_context>

<pallas_src>
import functools

import jax
import jax.numpy as jnp
from jax.experimental import pallas as pl
from jax.experimental.pallas import tpu as pltpu


def _sigmoid_via_tanh(v):
    # sigmoid(x) == 0.5 * (tanh(x / 2) + 1): one EUP op instead of exp + reciprocal.
    return 0.5 * jnp.tanh(0.5 * v) + 0.5


def _lstm_kernel(x_ref, wih_ref, whh_ref, b_ref, fcw_ref, fcb_ref,
                 h0_ref, c0_ref, out_ref, zx_ref, *, step, batch, hidden):
    """Whole forward in one invocation: hoisted x-projection (to VMEM scratch)
    + unrolled recurrence (h/c in vregs) + fc."""
    B, H = batch, hidden

    # Hoisted input projection for all timesteps at once: (step*B, I) @ (I, 4H) + bias.
    # Stored to VMEM scratch so only one (B, 4H) slice is live per recurrence step.
    zx_ref[...] = (jnp.dot(x_ref[...], wih_ref[...],
                           preferred_element_type=jnp.float32)
                   + b_ref[...])                                  # (step*B, 4H)

    h = h0_ref[...]                                               # (B, H)
    c = c0_ref[...]                                               # (B, H)

    # `step` is a small static Python int -> fully unrolled; h/c stay in vregs.
    # whh_ref[...] is read inside the dot each iteration (streamed from VMEM to the
    # MXU) rather than being held as a 64-vreg SSA value across the loop.
    for j in range(step):
        z = zx_ref[j * B:(j + 1) * B, :] + jnp.dot(
            h, whh_ref[...], preferred_element_type=jnp.float32)  # (B, 4H)
        i_g = _sigmoid_via_tanh(z[:, 0 * H:1 * H])
        f_g = _sigmoid_via_tanh(z[:, 1 * H:2 * H])
        g_g = jnp.tanh(z[:, 2 * H:3 * H])
        o_g = _sigmoid_via_tanh(z[:, 3 * H:4 * H])
        c = f_g * c + i_g * g_g
        h = o_g * jnp.tanh(c)

    # Final Linear(hidden, 1): VPU multiply + lane reduction (XLU) instead of a
    # 1-lane MXU pass.  Raw output, no sigmoid (matches forward()).
    out_ref[...] = (jnp.sum(h * fcw_ref[...], axis=-1, keepdims=True)
                    + fcb_ref[...])                               # (B, 1)


def prepare_lstm_params(params):
    """One-time weight prep (transposes / casts / bias fold) hoisted out of the
    per-call hot path.  Call once at init; pass the result to every forward."""
    H = params["w_hh"].shape[1]
    prepped = {
        "w_ih_t": jnp.asarray(params["w_ih"], jnp.float32).T,     # (I, 4H)
        "w_hh_t": jnp.asarray(params["w_hh"], jnp.float32).T,     # (H, 4H)
        "bias": (jnp.asarray(params["b_ih"], jnp.float32)
                 + jnp.asarray(params["b_hh"], jnp.float32)).reshape(1, 4 * H),
        "fc_w": jnp.asarray(params["fc_w"], jnp.float32),         # (1, H)
        "fc_b": jnp.asarray(params["fc_b"], jnp.float32).reshape(1, 1),
    }
    return jax.tree_util.tree_map(jax.block_until_ready, prepped)


@functools.partial(jax.jit, static_argnames=("depth",))
def lstm_classifier_forward(x_seq, prepped, hidden_state, depth):
    """Equivalent of LSTMClassifier.forward.

    x_seq: (step, batch, inputSize) float32 (time-major, like the PyTorch `t1`)
    prepped: output of prepare_lstm_params
    hidden_state: (h0, c0), each (batch, hidden)
    depth: self.lstm_depth -- caps the number of recurrence steps (static)
    """
    n_steps, B, I = x_seq.shape
    H = prepped["w_hh_t"].shape[0]
    step = min(n_steps, depth)    # `if self.lstm_depth < step: step = self.lstm_depth`

    h0, c0 = hidden_state
    h0 = h0.astype(jnp.float32)
    c0 = c0.astype(jnp.float32)

    if step <= 0:
        # Empty recurrence: forward degenerates to fc(h0).
        return jnp.sum(h0 * prepped["fc_w"], axis=-1, keepdims=True) + prepped["fc_b"]

    x_flat = x_seq[:step].astype(jnp.float32).reshape(step * B, I)   # (step*B, I)

    kernel = functools.partial(_lstm_kernel, step=step, batch=B, hidden=H)

    out = pl.pallas_call(
        kernel,
        out_shape=jax.ShapeDtypeStruct((B, 1), jnp.float32),
        in_specs=[pl.BlockSpec(memory_space=pltpu.MemorySpace.VMEM)
                  for _ in range(8)],
        out_specs=pl.BlockSpec(memory_space=pltpu.MemorySpace.VMEM),
        scratch_shapes=[pltpu.VMEM((step * B, 4 * H), jnp.float32)],
    )(x_flat, prepped["w_ih_t"], prepped["w_hh_t"], prepped["bias"],
      prepped["fc_w"], prepped["fc_b"], h0, c0)
    return out


def _reference_forward(x_seq, params, hidden_state, depth):
    """Pure-JAX reference mirroring nn.LSTMCell + nn.Linear semantics."""
    step = min(x_seq.shape[0], depth)
    h, c = hidden_state
    H = params["w_hh"].shape[1]
    for j in range(step):
        x = x_seq[j]
        z = (x @ params["w_ih"].T + params["b_ih"]
             + h @ params["w_hh"].T + params["b_hh"])
        i_g = jax.nn.sigmoid(z[:, 0 * H:1 * H])
        f_g = jax.nn.sigmoid(z[:, 1 * H:2 * H])
        g_g = jnp.tanh(z[:, 2 * H:3 * H])
        o_g = jax.nn.sigmoid(z[:, 3 * H:4 * H])
        c = f_g * c + i_g * g_g
        h = o_g * jnp.tanh(c)
    return h @ params["fc_w"].T + params["fc_b"]


if __name__ == "__main__":
    # Small, deterministic shapes consistent with the module.
    inputSize = 32
    hiddenSize = 128
    batch = 8
    step = 8
    depth = 10          # lstm_depth >= step, so all 8 timesteps run

    key = jax.random.PRNGKey(0)
    ks = jax.random.split(key, 9)
    initrange = 1.0 / jnp.sqrt(hiddenSize)   # PyTorch LSTMCell default init range

    params = {
        "w_ih": jax.random.uniform(ks[0], (4 * hiddenSize, inputSize),
                                   jnp.float32, -initrange, initrange),
        "w_hh": jax.random.uniform(ks[1], (4 * hiddenSize, hiddenSize),
                                   jnp.float32, -initrange, initrange),
        "b_ih": jax.random.uniform(ks[2], (4 * hiddenSize,),
                                   jnp.float32, -initrange, initrange),
        "b_hh": jax.random.uniform(ks[3], (4 * hiddenSize,),
                                   jnp.float32, -initrange, initrange),
        "fc_w": jax.random.uniform(ks[4], (1, hiddenSize),
                                   jnp.float32, -initrange, initrange),
        "fc_b": jax.random.uniform(ks[5], (1,),
                                   jnp.float32, -initrange, initrange),
    }

    x_seq = jax.random.normal(ks[6], (step, batch, inputSize), jnp.float32)
    h0 = jax.random.normal(ks[7], (batch, hiddenSize), jnp.float32) * 0.1
    c0 = jax.random.normal(ks[8], (batch, hiddenSize), jnp.float32) * 0.1

    # One-time weight prep (hoisted out of the per-call hot path).
    prepped = prepare_lstm_params(params)

    # Full-length recurrence.
    y = lstm_classifier_forward(x_seq, prepped, (h0, c0), depth)
    y = jax.block_until_ready(y)
    y_ref = _reference_forward(x_seq, params, (h0, c0), depth)
    assert y.shape == (batch, 1)
    assert jnp.allclose(y, y_ref, atol=1e-4, rtol=1e-4), (y, y_ref)

    # Depth-truncated recurrence (lstm_depth < step path).
    y5 = jax.block_until_ready(lstm_classifier_forward(x_seq, prepped, (h0, c0), 5))
    y5_ref = _reference_forward(x_seq, params, (h0, c0), 5)
    assert jnp.allclose(y5, y5_ref, atol=1e-4, rtol=1e-4), (y5, y5_ref)

    print("KERNEL_OK")
</pallas_src>

<mosaic_0001>
module attributes {stable_mosaic.version = 11 : i64} {
  func.func @_lstm_kernel(%arg0: memref<64x32xf32, #tpu.memory_space<vmem>>, %arg1: memref<32x512xf32, #tpu.memory_space<vmem>>, %arg2: memref<128x512xf32, #tpu.memory_space<vmem>>, %arg3: memref<1x512xf32, #tpu.memory_space<vmem>>, %arg4: memref<1x128xf32, #tpu.memory_space<vmem>>, %arg5: memref<1x1xf32, #tpu.memory_space<vmem>>, %arg6: memref<8x128xf32, #tpu.memory_space<vmem>>, %arg7: memref<8x128xf32, #tpu.memory_space<vmem>>, %arg8: memref<8x1xf32, #tpu.memory_space<vmem>>, %arg9: memref<64x512xf32, #tpu.memory_space<vmem>>) attributes {dimension_semantics = [], scalar_prefetch = 0 : i64, scratch_operands = 1 : i64, tpu.core_type = #tpu.core_type<tc>} {
    %c0 = arith.constant 0 : index
    %c0_0 = arith.constant 0 : index
    %0 = vector.load %arg0[%c0, %c0_0] : memref<64x32xf32, #tpu.memory_space<vmem>>, vector<64x32xf32>
    %c0_1 = arith.constant 0 : index
    %c0_2 = arith.constant 0 : index
    %1 = vector.load %arg1[%c0_1, %c0_2] : memref<32x512xf32, #tpu.memory_space<vmem>>, vector<32x512xf32>
    %cst = arith.constant dense<0.000000e+00> : vector<64x512xf32>
    %2 = tpu.matmul %0, %1, %cst {dimension_numbers = #tpu.dot_dimension_numbers<[1], [0], [0], [1], [0, 0, 1, 1], [], []>} : vector<64x32xf32>, vector<32x512xf32>, vector<64x512xf32> -> vector<64x512xf32>
    %c0_3 = arith.constant 0 : index
    %c0_4 = arith.constant 0 : index
    %3 = vector.load %arg3[%c0_3, %c0_4] : memref<1x512xf32, #tpu.memory_space<vmem>>, vector<1x512xf32>
    %4 = vector.broadcast %3 : vector<1x512xf32> to vector<64x512xf32>
    %5 = arith.addf %2, %4 : vector<64x512xf32>
    %c0_5 = arith.constant 0 : index
    %c0_6 = arith.constant 0 : index
    %6 = vector.load %arg9[%c0_5, %c0_6] : memref<64x512xf32, #tpu.memory_space<vmem>>, vector<64x512xf32>
    tpu.vector_store %arg9[%c0_5, %c0_6], %5 {strides = array<i32>} : memref<64x512xf32, #tpu.memory_space<vmem>>, vector<64x512xf32>,
    %c0_7 = arith.constant 0 : index
    %c0_8 = arith.constant 0 : index
    %7 = vector.load %arg6[%c0_7, %c0_8] : memref<8x128xf32, #tpu.memory_space<vmem>>, vector<8x128xf32>
    %c0_9 = arith.constant 0 : index
    %c0_10 = arith.constant 0 : index
    %8 = vector.load %arg7[%c0_9, %c0_10] : memref<8x128xf32, #tpu.memory_space<vmem>>, vector<8x128xf32>
    %c0_11 = arith.constant 0 : index
    %c0_12 = arith.constant 0 : index
    %9 = vector.load %arg9[%c0_11, %c0_12] : memref<64x512xf32, #tpu.memory_space<vmem>>, vector<8x512xf32>
    %c0_13 = arith.constant 0 : index
    %c0_14 = arith.constant 0 : index
    %10 = vector.load %arg2[%c0_13, %c0_14] : memref<128x512xf32, #tpu.memory_space<vmem>>, vector<128x512xf32>
    %cst_15 = arith.constant dense<0.000000e+00> : vector<8x512xf32>
    %11 = tpu.matmul %7, %10, %cst_15 {dimension_numbers = #tpu.dot_dimension_numbers<[1], [0], [0], [1], [0, 0, 1, 1], [], []>} : vector<8x128xf32>, vector<128x512xf32>, vector<8x512xf32> -> vector<8x512xf32>
    %12 = arith.addf %9, %11 : vector<8x512xf32>
    %13 = vector.extract_strided_slice %12 {offsets = [0, 0], sizes = [8, 128], strides = [1, 1]} : vector<8x512xf32> to vector<8x128xf32>
    %cst_16 = arith.constant 5.000000e-01 : f32
    %14 = vector.broadcast %cst_16 : f32 to vector<8x128xf32>
    %15 = arith.mulf %14, %13 : vector<8x128xf32>
    %16 = math.tanh %15 : vector<8x128xf32>
    %cst_17 = arith.constant 5.000000e-01 : f32
    %17 = vector.broadcast %cst_17 : f32 to vector<8x128xf32>
    %18 = arith.mulf %17, %16 : vector<8x128xf32>
    %cst_18 = arith.constant 5.000000e-01 : f32
    %19 = vector.broadcast %cst_18 : f32 to vector<8x128xf32>
    %20 = arith.addf %18, %19 : vector<8x128xf32>
    %21 = vector.extract_strided_slice %12 {offsets = [0, 128], sizes = [8, 128], strides = [1, 1]} : vector<8x512xf32> to vector<8x128xf32>
    %cst_19 = arith.constant 5.000000e-01 : f32
    %22 = vector.broadcast %cst_19 : f32 to vector<8x128xf32>
    %23 = arith.mulf %22, %21 : vector<8x128xf32>
    %24 = math.tanh %23 : vector<8x128xf32>
    %cst_20 = arith.constant 5.000000e-01 : f32
    %25 = vector.broadcast %cst_20 : f32 to vector<8x128xf32>
    %26 = arith.mulf %25, %24 : vector<8x128xf32>
    %cst_21 = arith.constant 5.000000e-01 : f32
    %27 = vector.broadcast %cst_21 : f32 to vector<8x128xf32>
    %28 = arith.addf %26, %27 : vector<8x128xf32>
    %29 = vector.extract_strided_slice %12 {offsets = [0, 256], sizes = [8, 128], strides = [1, 1]} : vector<8x512xf32> to vector<8x128xf32>
    %30 = math.tanh %29 : vector<8x128xf32>
    %31 = vector.extract_strided_slice %12 {offsets = [0, 384], sizes = [8, 128], strides = [1, 1]} : vector<8x512xf32> to vector<8x128xf32>
    %cst_22 = arith.constant 5.000000e-01 : f32
    %32 = vector.broadcast %cst_22 : f32 to vector<8x128xf32>
    %33 = arith.mulf %32, %31 : vector<8x128xf32>
    %34 = math.tanh %33 : vector<8x128xf32>
    %cst_23 = arith.constant 5.000000e-01 : f32
    %35 = vector.broadcast %cst_23 : f32 to vector<8x128xf32>
    %36 = arith.mulf %35, %34 : vector<8x128xf32>
    %cst_24 = arith.constant 5.000000e-01 : f32
    %37 = vector.broadcast %cst_24 : f32 to vector<8x128xf32>
    %38 = arith.addf %36, %37 : vector<8x128xf32>
    %39 = arith.mulf %28, %8 : vector<8x128xf32>
    %40 = arith.mulf %20, %30 : vector<8x128xf32>
    %41 = arith.addf %39, %40 : vector<8x128xf32>
    %42 = math.tanh %41 : vector<8x128xf32>
    %43 = arith.mulf %38, %42 : vector<8x128xf32>
    %c8 = arith.constant 8 : index
    %c0_25 = arith.constant 0 : index
    %44 = vector.load %arg9[%c8, %c0_25] : memref<64x512xf32, #tpu.memory_space<vmem>>, vector<8x512xf32>
    %c0_26 = arith.constant 0 : index
    %c0_27 = arith.constant 0 : index
    %45 = vector.load %arg2[%c0_26, %c0_27] : memref<128x512xf32, #tpu.memory_space<vmem>>, vector<128x512xf32>
    %cst_28 = arith.constant dense<0.000000e+00> : vector<8x512xf32>
    %46 = tpu.matmul %43, %45, %cst_28 {dimension_numbers = #tpu.dot_dimension_numbers<[1], [0], [0], [1], [0, 0, 1, 1], [], []>} : vector<8x128xf32>, vector<128x512xf32>, vector<8x512xf32> -> vector<8x512xf32>
    %47 = arith.addf %44, %46 : vector<8x512xf32>
    %48 = vector.extract_strided_slice %47 {offsets = [0, 0], sizes = [8, 128], strides = [1, 1]} : vector<8x512xf32> to vector<8x128xf32>
    %cst_29 = arith.constant 5.000000e-01 : f32
    %49 = vector.broadcast %cst_29 : f32 to vector<8x128xf32>
    %50 = arith.mulf %49, %48 : vector<8x128xf32>
    %51 = math.tanh %50 : vector<8x128xf32>
    %cst_30 = arith.constant 5.000000e-01 : f32
    %52 = vector.broadcast %cst_30 : f32 to vector<8x128xf32>
    %53 = arith.mulf %52, %51 : vector<8x128xf32>
    %cst_31 = arith.constant 5.000000e-01 : f32
    %54 = vector.broadcast %cst_31 : f32 to vector<8x128xf32>
    %55 = arith.addf %53, %54 : vector<8x128xf32>
    %56 = vector.extract_strided_slice %47 {offsets = [0, 128], sizes = [8, 128], strides = [1, 1]} : vector<8x512xf32> to vector<8x128xf32>
    %cst_32 = arith.constant 5.000000e-01 : f32
    %57 = vector.broadcast %cst_32 : f32 to vector<8x128xf32>
    %58 = arith.mulf %57, %56 : vector<8x128xf32>
    %59 = math.tanh %58 : vector<8x128xf32>
    %cst_33 = arith.constant 5.000000e-01 : f32
    %60 = vector.broadcast %cst_33 : f32 to vector<8x128xf32>
    %61 = arith.mulf %60, %59 : vector<8x128xf32>
    %cst_34 = arith.constant 5.000000e-01 : f32
    %62 = vector.broadcast %cst_34 : f32 to vector<8x128xf32>
    %63 = arith.addf %61, %62 : vector<8x128xf32>
    %64 = vector.extract_strided_slice %47 {offsets = [0, 256], sizes = [8, 128], strides = [1, 1]} : vector<8x512xf32> to vector<8x128xf32>
    %65 = math.tanh %64 : vector<8x128xf32>
    %66 = vector.extract_strided_slice %47 {offsets = [0, 384], sizes = [8, 128], strides = [1, 1]} : vector<8x512xf32> to vector<8x128xf32>
    %cst_35 = arith.constant 5.000000e-01 : f32
    %67 = vector.broadcast %cst_35 : f32 to vector<8x128xf32>
    %68 = arith.mulf %67, %66 : vector<8x128xf32>
    %69 = math.tanh %68 : vector<8x128xf32>
    %cst_36 = arith.constant 5.000000e-01 : f32
    %70 = vector.broadcast %cst_36 : f32 to vector<8x128xf32>
    %71 = arith.mulf %70, %69 : vector<8x128xf32>
    %cst_37 = arith.constant 5.000000e-01 : f32
    %72 = vector.broadcast %cst_37 : f32 to vector<8x128xf32>
    %73 = arith.addf %71, %72 : vector<8x128xf32>
    %74 = arith.mulf %63, %41 : vector<8x128xf32>
    %75 = arith.mulf %55, %65 : vector<8x128xf32>
    %76 = arith.addf %74, %75 : vector<8x128xf32>
    %77 = math.tanh %76 : vector<8x128xf32>
    %78 = arith.mulf %73, %77 : vector<8x128xf32>
    %c16 = arith.constant 16 : index
    %c0_38 = arith.constant 0 : index
    %79 = vector.load %arg9[%c16, %c0_38] : memref<64x512xf32, #tpu.memory_space<vmem>>, vector<8x512xf32>
    %c0_39 = arith.constant 0 : index
    %c0_40 = arith.constant 0 : index
    %80 = vector.load %arg2[%c0_39, %c0_40] : memref<128x512xf32, #tpu.memory_space<vmem>>, vector<128x512xf32>
    %cst_41 = arith.constant dense<0.000000e+00> : vector<8x512xf32>
    %81 = tpu.matmul %78, %80, %cst_41 {dimension_numbers = #tpu.dot_dimension_numbers<[1], [0], [0], [1], [0, 0, 1, 1], [], []>} : vector<8x128xf32>, vector<128x512xf32>, vector<8x512xf32> -> vector<8x512xf32>
    %82 = arith.addf %79, %81 : vector<8x512xf32>
    %83 = vector.extract_strided_slice %82 {offsets = [0, 0], sizes = [8, 128], strides = [1, 1]} : vector<8x512xf32> to vector<8x128xf32>
    %cst_42 = arith.constant 5.000000e-01 : f32
    %84 = vector.broadcast %cst_42 : f32 to vector<8x128xf32>
    %85 = arith.mulf %84, %83 : vector<8x128xf32>
    %86 = math.tanh %85 : vector<8x128xf32>
    %cst_43 = arith.constant 5.000000e-01 : f32
    %87 = vector.broadcast %cst_43 : f32 to vector<8x128xf32>
    %88 = arith.mulf %87, %86 : vector<8x128xf32>
    %cst_44 = arith.constant 5.000000e-01 : f32
    %89 = vector.broadcast %cst_44 : f32 to vector<8x128xf32>
    %90 = arith.addf %88, %89 : vector<8x128xf32>
    %91 = vector.extract_strided_slice %82 {offsets = [0, 128], sizes = [8, 128], strides = [1, 1]} : vector<8x512xf32> to vector<8x128xf32>
    %cst_45 = arith.constant 5.000000e-01 : f32
    %92 = vector.broadcast %cst_45 : f32 to vector<8x128xf32>
    %93 = arith.mulf %92, %91 : vector<8x128xf32>
    %94 = math.tanh %93 : vector<8x128xf32>
    %cst_46 = arith.constant 5.000000e-01 : f32
    %95 = vector.broadcast %cst_46 : f32 to vector<8x128xf32>
    %96 = arith.mulf %95, %94 : vector<8x128xf32>
    %cst_47 = arith.constant 5.000000e-01 : f32
    %97 = vector.broadcast %cst_47 : f32 to vector<8x128xf32>
    %98 = arith.addf %96, %97 : vector<8x128xf32>
    %99 = vector.extract_strided_slice %82 {offsets = [0, 256], sizes = [8, 128], strides = [1, 1]} : vector<8x512xf32> to vector<8x128xf32>
    %100 = math.tanh %99 : vector<8x128xf32>
    %101 = vector.extract_strided_slice %82 {offsets = [0, 384], sizes = [8, 128], strides = [1, 1]} : vector<8x512xf32> to vector<8x128xf32>
    %cst_48 = arith.constant 5.000000e-01 : f32
    %102 = vector.broadcast %cst_48 : f32 to vector<8x128xf32>
    %103 = arith.mulf %102, %101 : vector<8x128xf32>
    %104 = math.tanh %103 : vector<8x128xf32>
    %cst_49 = arith.constant 5.000000e-01 : f32
    %105 = vector.broadcast %cst_49 : f32 to vector<8x128xf32>
    %106 = arith.mulf %105, %104 : vector<8x128xf32>
    %cst_50 = arith.constant 5.000000e-01 : f32
    %107 = vector.broadcast %cst_50 : f32 to vector<8x128xf32>
    %108 = arith.addf %106, %107 : vector<8x128xf32>
    %109 = arith.mulf %98, %76 : vector<8x128xf32>
    %110 = arith.mulf %90, %100 : vector<8x128xf32>
    %111 = arith.addf %109, %110 : vector<8x128xf32>
    %112 = math.tanh %111 : vector<8x128xf32>
    %113 = arith.mulf %108, %112 : vector<8x128xf32>
    %c24 = arith.constant 24 : index
    %c0_51 = arith.constant 0 : index
    %114 = vector.load %arg9[%c24, %c0_51] : memref<64x512xf32, #tpu.memory_space<vmem>>, vector<8x512xf32>
    %c0_52 = arith.constant 0 : index
    %c0_53 = arith.constant 0 : index
    %115 = vector.load %arg2[%c0_52, %c0_53] : memref<128x512xf32, #tpu.memory_space<vmem>>, vector<128x512xf32>
    %cst_54 = arith.constant dense<0.000000e+00> : vector<8x512xf32>
    %116 = tpu.matmul %113, %115, %cst_54 {dimension_numbers = #tpu.dot_dimension_numbers<[1], [0], [0], [1], [0, 0, 1, 1], [], []>} : vector<8x128xf32>, vector<128x512xf32>, vector<8x512xf32> -> vector<8x512xf32>
    %117 = arith.addf %114, %116 : vector<8x512xf32>
    %118 = vector.extract_strided_slice %117 {offsets = [0, 0], sizes = [8, 128], strides = [1, 1]} : vector<8x512xf32> to vector<8x128xf32>
    %cst_55 = arith.constant 5.000000e-01 : f32
    %119 = vector.broadcast %cst_55 : f32 to vector<8x128xf32>
    %120 = arith.mulf %119, %118 : vector<8x128xf32>
    %121 = math.tanh %120 : vector<8x128xf32>
    %cst_56 = arith.constant 5.000000e-01 : f32
    %122 = vector.broadcast %cst_56 : f32 to vector<8x128xf32>
    %123 = arith.mulf %122, %121 : vector<8x128xf32>
    %cst_57 = arith.constant 5.000000e-01 : f32
    %124 = vector.broadcast %cst_57 : f32 to vector<8x128xf32>
    %125 = arith.addf %123, %124 : vector<8x128xf32>
    %126 = vector.extract_strided_slice %117 {offsets = [0, 128], sizes = [8, 128], strides = [1, 1]} : vector<8x512xf32> to vector<8x128xf32>
    %cst_58 = arith.constant 5.000000e-01 : f32
    %127 = vector.broadcast %cst_58 : f32 to vector<8x128xf32>
    %128 = arith.mulf %127, %126 : vector<8x128xf32>
    %129 = math.tanh %128 : vector<8x128xf32>
    %cst_59 = arith.constant 5.000000e-01 : f32
    %130 = vector.broadcast %cst_59 : f32 to vector<8x128xf32>
    %131 = arith.mulf %130, %129 : vector<8x128xf32>
    %cst_60 = arith.constant 5.000000e-01 : f32
    %132 = vector.broadcast %cst_60 : f32 to vector<8x128xf32>
    %133 = arith.addf %131, %132 : vector<8x128xf32>
    %134 = vector.extract_strided_slice %117 {offsets = [0, 256], sizes = [8, 128], strides = [1, 1]} : vector<8x512xf32> to vector<8x128xf32>
    %135 = math.tanh %134 : vector<8x128xf32>
    %136 = vector.extract_strided_slice %117 {offsets = [0, 384], sizes = [8, 128], strides = [1, 1]} : vector<8x512xf32> to vector<8x128xf32>
    %cst_61 = arith.constant 5.000000e-01 : f32
    %137 = vector.broadcast %cst_61 : f32 to vector<8x128xf32>
    %138 = arith.mulf %137, %136 : vector<8x128xf32>
    %139 = math.tanh %138 : vector<8x128xf32>
    %cst_62 = arith.constant 5.000000e-01 : f32
    %140 = vector.broadcast %cst_62 : f32 to vector<8x128xf32>
    %141 = arith.mulf %140, %139 : vector<8x128xf32>
    %cst_63 = arith.constant 5.000000e-01 : f32
    %142 = vector.broadcast %cst_63 : f32 to vector<8x128xf32>
    %143 = arith.addf %141, %142 : vector<8x128xf32>
    %144 = arith.mulf %133, %111 : vector<8x128xf32>
    %145 = arith.mulf %125, %135 : vector<8x128xf32>
    %146 = arith.addf %144, %145 : vector<8x128xf32>
    %147 = math.tanh %146 : vector<8x128xf32>
    %148 = arith.mulf %143, %147 : vector<8x128xf32>
    %c32 = arith.constant 32 : index
    %c0_64 = arith.constant 0 : index
    %149 = vector.load %arg9[%c32, %c0_64] : memref<64x512xf32, #tpu.memory_space<vmem>>, vector<8x512xf32>
    %c0_65 = arith.constant 0 : index
    %c0_66 = arith.constant 0 : index
    %150 = vector.load %arg2[%c0_65, %c0_66] : memref<128x512xf32, #tpu.memory_space<vmem>>, vector<128x512xf32>
    %cst_67 = arith.constant dense<0.000000e+00> : vector<8x512xf32>
    %151 = tpu.matmul %148, %150, %cst_67 {dimension_numbers = #tpu.dot_dimension_numbers<[1], [0], [0], [1], [0, 0, 1, 1], [], []>} : vector<8x128xf32>, vector<128x512xf32>, vector<8x512xf32> -> vector<8x512xf32>
    %152 = arith.addf %149, %151 : vector<8x512xf32>
    %153 = vector.extract_strided_slice %152 {offsets = [0, 0], sizes = [8, 128], strides = [1, 1]} : vector<8x512xf32> to vector<8x128xf32>
    %cst_68 = arith.constant 5.000000e-01 : f32
    %154 = vector.broadcast %cst_68 : f32 to vector<8x128xf32>
    %155 = arith.mulf %154, %153 : vector<8x128xf32>
    %156 = math.tanh %155 : vector<8x128xf32>
    %cst_69 = arith.constant 5.000000e-01 : f32
    %157 = vector.broadcast %cst_69 : f32 to vector<8x128xf32>
    %158 = arith.mulf %157, %156 : vector<8x128xf32>
    %cst_70 = arith.constant 5.000000e-01 : f32
    %159 = vector.broadcast %cst_70 : f32 to vector<8x128xf32>
    %160 = arith.addf %158, %159 : vector<8x128xf32>
    %161 = vector.extract_strided_slice %152 {offsets = [0, 128], sizes = [8, 128], strides = [1, 1]} : vector<8x512xf32> to vector<8x128xf32>
    %cst_71 = arith.constant 5.000000e-01 : f32
    %162 = vector.broadcast %cst_71 : f32 to vector<8x128xf32>
    %163 = arith.mulf %162, %161 : vector<8x128xf32>
    %164 = math.tanh %163 : vector<8x128xf32>
    %cst_72 = arith.constant 5.000000e-01 : f32
    %165 = vector.broadcast %cst_72 : f32 to vector<8x128xf32>
    %166 = arith.mulf %165, %164 : vector<8x128xf32>
    %cst_73 = arith.constant 5.000000e-01 : f32
    %167 = vector.broadcast %cst_73 : f32 to vector<8x128xf32>
    %168 = arith.addf %166, %167 : vector<8x128xf32>
    %169 = vector.extract_strided_slice %152 {offsets = [0, 256], sizes = [8, 128], strides = [1, 1]} : vector<8x512xf32> to vector<8x128xf32>
    %170 = math.tanh %169 : vector<8x128xf32>
    %171 = vector.extract_strided_slice %152 {offsets = [0, 384], sizes = [8, 128], strides = [1, 1]} : vector<8x512xf32> to vector<8x128xf32>
    %cst_74 = arith.constant 5.000000e-01 : f32
    %172 = vector.broadcast %cst_74 : f32 to vector<8x128xf32>
    %173 = arith.mulf %172, %171 : vector<8x128xf32>
    %174 = math.tanh %173 : vector<8x128xf32>
    %cst_75 = arith.constant 5.000000e-01 : f32
    %175 = vector.broadcast %cst_75 : f32 to vector<8x128xf32>
    %176 = arith.mulf %175, %174 : vector<8x128xf32>
    %cst_76 = arith.constant 5.000000e-01 : f32
    %177 = vector.broadcast %cst_76 : f32 to vector<8x128xf32>
    %178 = arith.addf %176, %177 : vector<8x128xf32>
    %179 = arith.mulf %168, %146 : vector<8x128xf32>
    %180 = arith.mulf %160, %170 : vector<8x128xf32>
    %181 = arith.addf %179, %180 : vector<8x128xf32>
    %182 = math.tanh %181 : vector<8x128xf32>
    %183 = arith.mulf %178, %182 : vector<8x128xf32>
    %c40 = arith.constant 40 : index
    %c0_77 = arith.constant 0 : index
    %184 = vector.load %arg9[%c40, %c0_77] : memref<64x512xf32, #tpu.memory_space<vmem>>, vector<8x512xf32>
    %c0_78 = arith.constant 0 : index
    %c0_79 = arith.constant 0 : index
    %185 = vector.load %arg2[%c0_78, %c0_79] : memref<128x512xf32, #tpu.memory_space<vmem>>, vector<128x512xf32>
    %cst_80 = arith.constant dense<0.000000e+00> : vector<8x512xf32>
    %186 = tpu.matmul %183, %185, %cst_80 {dimension_numbers = #tpu.dot_dimension_numbers<[1], [0], [0], [1], [0, 0, 1, 1], [], []>} : vector<8x128xf32>, vector<128x512xf32>, vector<8x512xf32> -> vector<8x512xf32>
    %187 = arith.addf %184, %186 : vector<8x512xf32>
    %188 = vector.extract_strided_slice %187 {offsets = [0, 0], sizes = [8, 128], strides = [1, 1]} : vector<8x512xf32> to vector<8x128xf32>
    %cst_81 = arith.constant 5.000000e-01 : f32
    %189 = vector.broadcast %cst_81 : f32 to vector<8x128xf32>
    %190 = arith.mulf %189, %188 : vector<8x128xf32>
    %191 = math.tanh %190 : vector<8x128xf32>
    %cst_82 = arith.constant 5.000000e-01 : f32
    %192 = vector.broadcast %cst_82 : f32 to vector<8x128xf32>
    %193 = arith.mulf %192, %191 : vector<8x128xf32>
    %cst_83 = arith.constant 5.000000e-01 : f32
    %194 = vector.broadcast %cst_83 : f32 to vector<8x128xf32>
    %195 = arith.addf %193, %194 : vector<8x128xf32>
    %196 = vector.extract_strided_slice %187 {offsets = [0, 128], sizes = [8, 128], strides = [1, 1]} : vector<8x512xf32> to vector<8x128xf32>
    %cst_84 = arith.constant 5.000000e-01 : f32
    %197 = vector.broadcast %cst_84 : f32 to vector<8x128xf32>
    %198 = arith.mulf %197, %196 : vector<8x128xf32>
    %199 = math.tanh %198 : vector<8x128xf32>
    %cst_85 = arith.constant 5.000000e-01 : f32
    %200 = vector.broadcast %cst_85 : f32 to vector<8x128xf32>
    %201 = arith.mulf %200, %199 : vector<8x128xf32>
    %cst_86 = arith.constant 5.000000e-01 : f32
    %202 = vector.broadcast %cst_86 : f32 to vector<8x128xf32>
    %203 = arith.addf %201, %202 : vector<8x128xf32>
    %204 = vector.extract_strided_slice %187 {offsets = [0, 256], sizes = [8, 128], strides = [1, 1]} : vector<8x512xf32> to vector<8x128xf32>
    %205 = math.tanh %204 : vector<8x128xf32>
    %206 = vector.extract_strided_slice %187 {offsets = [0, 384], sizes = [8, 128], strides = [1, 1]} : vector<8x512xf32> to vector<8x128xf32>
    %cst_87 = arith.constant 5.000000e-01 : f32
    %207 = vector.broadcast %cst_87 : f32 to vector<8x128xf32>
    %208 = arith.mulf %207, %206 : vector<8x128xf32>
    %209 = math.tanh %208 : vector<8x128xf32>
    %cst_88 = arith.constant 5.000000e-01 : f32
    %210 = vector.broadcast %cst_88 : f32 to vector<8x128xf32>
    %211 = arith.mulf %210, %209 : vector<8x128xf32>
    %cst_89 = arith.constant 5.000000e-01 : f32
    %212 = vector.broadcast %cst_89 : f32 to vector<8x128xf32>
    %213 = arith.addf %211, %212 : vector<8x128xf32>
    %214 = arith.mulf %203, %181 : vector<8x128xf32>
    %215 = arith.mulf %195, %205 : vector<8x128xf32>
    %216 = arith.addf %214, %215 : vector<8x128xf32>
    %217 = math.tanh %216 : vector<8x128xf32>
    %218 = arith.mulf %213, %217 : vector<8x128xf32>
    %c48 = arith.constant 48 : index
    %c0_90 = arith.constant 0 : index
    %219 = vector.load %arg9[%c48, %c0_90] : memref<64x512xf32, #tpu.memory_space<vmem>>, vector<8x512xf32>
    %c0_91 = arith.constant 0 : index
    %c0_92 = arith.constant 0 : index
    %220 = vector.load %arg2[%c0_91, %c0_92] : memref<128x512xf32, #tpu.memory_space<vmem>>, vector<128x512xf32>
    %cst_93 = arith.constant dense<0.000000e+00> : vector<8x512xf32>
    %221 = tpu.matmul %218, %220, %cst_93 {dimension_numbers = #tpu.dot_dimension_numbers<[1], [0], [0], [1], [0, 0, 1, 1], [], []>} : vector<8x128xf32>, vector<128x512xf32>, vector<8x512xf32> -> vector<8x512xf32>
    %222 = arith.addf %219, %221 : vector<8x512xf32>
    %223 = vector.extract_strided_slice %222 {offsets = [0, 0], sizes = [8, 128], strides = [1, 1]} : vector<8x512xf32> to vector<8x128xf32>
    %cst_94 = arith.constant 5.000000e-01 : f32
    %224 = vector.broadcast %cst_94 : f32 to vector<8x128xf32>
    %225 = arith.mulf %224, %223 : vector<8x128xf32>
    %226 = math.tanh %225 : vector<8x128xf32>
    %cst_95 = arith.constant 5.000000e-01 : f32
    %227 = vector.broadcast %cst_95 : f32 to vector<8x128xf32>
    %228 = arith.mulf %227, %226 : vector<8x128xf32>
    %cst_96 = arith.constant 5.000000e-01 : f32
    %229 = vector.broadcast %cst_96 : f32 to vector<8x128xf32>
    %230 = arith.addf %228, %229 : vector<8x128xf32>
    %231 = vector.extract_strided_slice %222 {offsets = [0, 128], sizes = [8, 128], strides = [1, 1]} : vector<8x512xf32> to vector<8x128xf32>
    %cst_97 = arith.constant 5.000000e-01 : f32
    %232 = vector.broadcast %cst_97 : f32 to vector<8x128xf32>
    %233 = arith.mulf %232, %231 : vector<8x128xf32>
    %234 = math.tanh %233 : vector<8x128xf32>
    %cst_98 = arith.constant 5.000000e-01 : f32
    %235 = vector.broadcast %cst_98 : f32 to vector<8x128xf32>
    %236 = arith.mulf %235, %234 : vector<8x128xf32>
    %cst_99 = arith.constant 5.000000e-01 : f32
    %237 = vector.broadcast %cst_99 : f32 to vector<8x128xf32>
    %238 = arith.addf %236, %237 : vector<8x128xf32>
    %239 = vector.extract_strided_slice %222 {offsets = [0, 256], sizes = [8, 128], strides = [1, 1]} : vector<8x512xf32> to vector<8x128xf32>
    %240 = math.tanh %239 : vector<8x128xf32>
    %241 = vector.extract_strided_slice %222 {offsets = [0, 384], sizes = [8, 128], strides = [1, 1]} : vector<8x512xf32> to vector<8x128xf32>
    %cst_100 = arith.constant 5.000000e-01 : f32
    %242 = vector.broadcast %cst_100 : f32 to vector<8x128xf32>
    %243 = arith.mulf %242, %241 : vector<8x128xf32>
    %244 = math.tanh %243 : vector<8x128xf32>
    %cst_101 = arith.constant 5.000000e-01 : f32
    %245 = vector.broadcast %cst_101 : f32 to vector<8x128xf32>
    %246 = arith.mulf %245, %244 : vector<8x128xf32>
    %cst_102 = arith.constant 5.000000e-01 : f32
    %247 = vector.broadcast %cst_102 : f32 to vector<8x128xf32>
    %248 = arith.addf %246, %247 : vector<8x128xf32>
    %249 = arith.mulf %238, %216 : vector<8x128xf32>
    %250 = arith.mulf %230, %240 : vector<8x128xf32>
    %251 = arith.addf %249, %250 : vector<8x128xf32>
    %252 = math.tanh %251 : vector<8x128xf32>
    %253 = arith.mulf %248, %252 : vector<8x128xf32>
    %c56 = arith.constant 56 : index
    %c0_103 = arith.constant 0 : index
    %254 = vector.load %arg9[%c56, %c0_103] : memref<64x512xf32, #tpu.memory_space<vmem>>, vector<8x512xf32>
    %c0_104 = arith.constant 0 : index
    %c0_105 = arith.constant 0 : index
    %255 = vector.load %arg2[%c0_104, %c0_105] : memref<128x512xf32, #tpu.memory_space<vmem>>, vector<128x512xf32>
    %cst_106 = arith.constant dense<0.000000e+00> : vector<8x512xf32>
    %256 = tpu.matmul %253, %255, %cst_106 {dimension_numbers = #tpu.dot_dimension_numbers<[1], [0], [0], [1], [0, 0, 1, 1], [], []>} : vector<8x128xf32>, vector<128x512xf32>, vector<8x512xf32> -> vector<8x512xf32>
    %257 = arith.addf %254, %256 : vector<8x512xf32>
    %258 = vector.extract_strided_slice %257 {offsets = [0, 0], sizes = [8, 128], strides = [1, 1]} : vector<8x512xf32> to vector<8x128xf32>
    %cst_107 = arith.constant 5.000000e-01 : f32
    %259 = vector.broadcast %cst_107 : f32 to vector<8x128xf32>
    %260 = arith.mulf %259, %258 : vector<8x128xf32>
    %261 = math.tanh %260 : vector<8x128xf32>
    %cst_108 = arith.constant 5.000000e-01 : f32
    %262 = vector.broadcast %cst_108 : f32 to vector<8x128xf32>
    %263 = arith.mulf %262, %261 : vector<8x128xf32>
    %cst_109 = arith.constant 5.000000e-01 : f32
    %264 = vector.broadcast %cst_109 : f32 to vector<8x128xf32>
    %265 = arith.addf %263, %264 : vector<8x128xf32>
    %266 = vector.extract_strided_slice %257 {offsets = [0, 128], sizes = [8, 128], strides = [1, 1]} : vector<8x512xf32> to vector<8x128xf32>
    %cst_110 = arith.constant 5.000000e-01 : f32
    %267 = vector.broadcast %cst_110 : f32 to vector<8x128xf32>
    %268 = arith.mulf %267, %266 : vector<8x128xf32>
    %269 = math.tanh %268 : vector<8x128xf32>
    %cst_111 = arith.constant 5.000000e-01 : f32
    %270 = vector.broadcast %cst_111 : f32 to vector<8x128xf32>
    %271 = arith.mulf %270, %269 : vector<8x128xf32>
    %cst_112 = arith.constant 5.000000e-01 : f32
    %272 = vector.broadcast %cst_112 : f32 to vector<8x128xf32>
    %273 = arith.addf %271, %272 : vector<8x128xf32>
    %274 = vector.extract_strided_slice %257 {offsets = [0, 256], sizes = [8, 128], strides = [1, 1]} : vector<8x512xf32> to vector<8x128xf32>
    %275 = math.tanh %274 : vector<8x128xf32>
    %276 = vector.extract_strided_slice %257 {offsets = [0, 384], sizes = [8, 128], strides = [1, 1]} : vector<8x512xf32> to vector<8x128xf32>
    %cst_113 = arith.constant 5.000000e-01 : f32
    %277 = vector.broadcast %cst_113 : f32 to vector<8x128xf32>
    %278 = arith.mulf %277, %276 : vector<8x128xf32>
    %279 = math.tanh %278 : vector<8x128xf32>
    %cst_114 = arith.constant 5.000000e-01 : f32
    %280 = vector.broadcast %cst_114 : f32 to vector<8x128xf32>
    %281 = arith.mulf %280, %279 : vector<8x128xf32>
    %cst_115 = arith.constant 5.000000e-01 : f32
    %282 = vector.broadcast %cst_115 : f32 to vector<8x128xf32>
    %283 = arith.addf %281, %282 : vector<8x128xf32>
    %284 = arith.mulf %273, %251 : vector<8x128xf32>
    %285 = arith.mulf %265, %275 : vector<8x128xf32>
    %286 = arith.addf %284, %285 : vector<8x128xf32>
    %287 = math.tanh %286 : vector<8x128xf32>
    %288 = arith.mulf %283, %287 : vector<8x128xf32>
    %c0_116 = arith.constant 0 : index
    %c0_117 = arith.constant 0 : index
    %289 = vector.load %arg4[%c0_116, %c0_117] : memref<1x128xf32, #tpu.memory_space<vmem>>, vector<1x128xf32>
    %290 = vector.broadcast %289 : vector<1x128xf32> to vector<8x128xf32>
    %291 = arith.mulf %288, %290 : vector<8x128xf32>
    %cst_118 = arith.constant dense<0.000000e+00> : vector<8xf32>
    %292 = vector.multi_reduction <add>, %291, %cst_118 [1] : vector<8x128xf32> to vector<8xf32>
    %293 = vector.shape_cast %292 : vector<8xf32> to vector<8x1xf32>
    %c0_119 = arith.constant 0 : index
    %c0_120 = arith.constant 0 : index
    %294 = vector.load %arg5[%c0_119, %c0_120] : memref<1x1xf32, #tpu.memory_space<vmem>>, vector<1x1xf32>
    %295 = vector.broadcast %294 : vector<1x1xf32> to vector<8x1xf32>
    %296 = arith.addf %293, %295 : vector<8x1xf32>
    %c0_121 = arith.constant 0 : index
    %c0_122 = arith.constant 0 : index
    %297 = vector.load %arg8[%c0_121, %c0_122] : memref<8x1xf32, #tpu.memory_space<vmem>>, vector<8x1xf32>
    tpu.vector_store %arg8[%c0_121, %c0_122], %296 {strides = array<i32>} : memref<8x1xf32, #tpu.memory_space<vmem>>, vector<8x1xf32>,
    return
  }
}

</mosaic_0001>

<bundles_post_ra>
// kernel: lstm_classifier_forward.1
= control target key start
LH: loop header
LB: loop body
LE: loop exit
PB: predicated region body
PF: predicated region fallthrough
CT: control target
= control target key end

     0   :  { %s3198_s0 = inlined_call_operand.hbm [shape: f32[64,32], index: 0, kind: input, shape index: {}]   ;;  %s3199_s1 = inlined_call_operand.hbm [shape: f32[32,512], index: 1, kind: input, shape index: {}]   ;;  %s3200_s2 = inlined_call_operand.hbm [shape: f32[128,512], index: 2, kind: input, shape index: {}]   ;;  %s3201_s3 = inlined_call_operand.hbm [shape: f32[1,512], index: 3, kind: input, shape index: {}]   ;;  %s3202_s4 = inlined_call_operand.vmem [shape: f32[1,128], index: 4, kind: input, shape index: {}]   ;;  %s3203_s5 = inlined_call_operand.<no memory space> [shape: f32[1,1], index: 5, kind: input, shape index: {}]   ;;  %s3204_s6 = inlined_call_operand.vmem [shape: f32[8,128], index: 6, kind: input, shape index: {}]   ;;  %s3205_s7 = inlined_call_operand.vmem [shape: f32[8,128], index: 7, kind: input, shape index: {}]   ;;  %s3206_s8 = inlined_call_operand.vmem [shape: f32[8,1], index: 8, kind: output, shape index: {}]  }
   0x1   :  { %v13_v0 = vstv %s3203_s5 }
   0x2   :  { %14 = vst [vmem:[#allocation3] sm:$0x1] %v13_v0 }
   0x3   :  { %15 = vsyncpa [#allocation5], 0 }
   0x4   :  { %16 = vsyncpa [#allocation7], 0 }
   0x5   :  { %17 = vsyncpa [#allocation10], 0  ;;  %s2643_s29 = smov [#allocation6]   ;;  %s2549_s11 = scalar_lea.hbm %s3199_s1, 2048 }
   0x6   :  { %s35_s30 = sshll.u32 %s2643_s29, 4  ;;  %p2550_p0 = scmp.ne.s32.totalorder %s3199_s1, %s2549_s11  ;;  %s36_s30 = int_to_ptr.vmem [resolvable:$true] %s35_s30 }
   0x7   :  { %p2553_p1 = scmp.lt.u32.totalorder %s2549_s11, %s3199_s1 }
   0x9   :  { %p2555_p2 = pnand %p2553_p1, %p2550_p0 }
   0xb   :  { %2558 = shalt.err (!%p2555_p2)
}
   0xc   :  { %s2559_s5 = scalar_lea.vmem %s36_s30, 2048  ;;  %p2564_p4 = scmp.lt.s32.totalorder %s36_s30, %s36_s30 }
   0xd   :  { %p2560_p3 = scmp.ne.s32.totalorder %s36_s30, %s2559_s5  ;;  %p2565_p5 = scmp.lt.s32.totalorder %s2559_s5, %s2559_s5 }
   0xf   :  { %p2566_p6 = por %p2565_p5, %p2564_p4 }
  0x11   :  { %p2567_p7 = pnand %p2566_p6, %p2560_p3 }
  0x13   :  { %2570 = shalt.err (!%p2567_p7)
}
  0x14   :  { %s2644_s16 = smov 512   ;;  %s2645_s17 = smov 32  }
  0x15   :  { %41 = dma.hbm_to_vmem [thread:$0]  %s3199_s1, 2048, %s36_s30, [#allocation7], %s2644_s16, %s2644_s16, %s2645_s17  }
  0x16   :  { %s2646_s20 = smov [#allocation4]   ;;  %s2571_s24 = scalar_lea.hbm %s3198_s0, 1024 }
  0x17   :  { %s23_s21 = sshll.u32 %s2646_s20, 4  ;;  %p2572_p8 = scmp.ne.s32.totalorder %s3198_s0, %s2571_s24  ;;  %s24_s21 = int_to_ptr.vmem [resolvable:$true] %s23_s21 }
  0x18   :  { %p2575_p9 = scmp.lt.u32.totalorder %s2571_s24, %s3198_s0 }
  0x1a   :  { %p2577_p10 = pnand %p2575_p9, %p2572_p8 }
  0x1c   :  { %2580 = shalt.err (!%p2577_p10)
}
  0x1d   :  { %s2581_s29 = scalar_lea.vmem %s24_s21, 1024  ;;  %p2586_p12 = scmp.lt.s32.totalorder %s24_s21, %s24_s21 }
  0x1e   :  { %p2582_p11 = scmp.ne.s32.totalorder %s24_s21, %s2581_s29  ;;  %p2587_p13 = scmp.lt.s32.totalorder %s2581_s29, %s2581_s29 }
  0x20   :  { %p2588_p0 = por %p2587_p13, %p2586_p12 }
  0x22   :  { %p2589_p1 = pnand %p2588_p0, %p2582_p11 }
  0x24   :  { %2592 = shalt.err (!%p2589_p1)
}
  0x25   :  { %s2647_s1 = smov 128   ;;  %s2648_s30 = smov 8  }
  0x26   :  { %29 = dma.hbm_to_vmem [thread:$0]  %s3198_s0, 1024, %s24_s21, [#allocation5], %s2647_s1, %s2647_s1, %s2648_s30  }
  0x27   :  { %s2649_s11 = smov [#allocation8]   ;;  %s2650_s13 = smov [#allocation9]  }
  0x28   :  { %s47_s12 = sshll.u32 %s2649_s11, 4  ;;  %s60_s14 = sshll.u32 %s2650_s13, 4  ;;  %s48_s12 = int_to_ptr.vmem [resolvable:$true] %s47_s12  ;;  %s61_s14 = int_to_ptr.vmem [resolvable:$true] %s60_s14 }
  0x29   :  { %s2593_s18 = scalar_lea.hbm %s3200_s2, 8192 }
  0x2a   :  { %p2594_p2 = scmp.ne.s32.totalorder %s3200_s2, %s2593_s18  ;;  %p2597_p3 = scmp.lt.u32.totalorder %s2593_s18, %s3200_s2 }
  0x2c   :  { %p2599_p4 = pnand %p2597_p3, %p2594_p2 }
  0x2e   :  { %2602 = shalt.err (!%p2599_p4)
}
  0x2f   :  { %s2603_s0 = scalar_lea.vmem %s48_s12, 8192  ;;  %p2608_p6 = scmp.lt.s32.totalorder %s48_s12, %s48_s12 }
  0x30   :  { %p2604_p5 = scmp.ne.s32.totalorder %s48_s12, %s2603_s0  ;;  %p2609_p7 = scmp.lt.s32.totalorder %s2603_s0, %s2603_s0 }
  0x32   :  { %p2610_p8 = por %p2609_p7, %p2608_p6 }
  0x34   :  { %p2611_p9 = pnand %p2610_p8, %p2604_p5 }
  0x36   :  { %2614 = shalt.err (!%p2611_p9)
}
  0x37   :  { %53 = dma.hbm_to_vmem [thread:$0]  %s3200_s2, 8192, %s48_s12, [#allocation7], %s2644_s16, %s2644_s16, %s2645_s17  }
  0x38   :  { %s2615_s27 = scalar_lea.hbm %s3201_s3, 64 }
  0x39   :  { %p2616_p10 = scmp.ne.s32.totalorder %s3201_s3, %s2615_s27  ;;  %p2619_p11 = scmp.lt.u32.totalorder %s2615_s27, %s3201_s3 }
  0x3b   :  { %p2621_p12 = pnand %p2619_p11, %p2616_p10 }
  0x3d   :  { %2624 = shalt.err (!%p2621_p12)
}
  0x3e   :  { %s2625_s9 = scalar_lea.vmem %s61_s14, 64  ;;  %p2630_p0 = scmp.lt.s32.totalorder %s61_s14, %s61_s14 }
  0x3f   :  { %p2626_p13 = scmp.ne.s32.totalorder %s61_s14, %s2625_s9  ;;  %p2631_p1 = scmp.lt.s32.totalorder %s2625_s9, %s2625_s9 }
  0x41   :  { %p2632_p2 = por %p2631_p1, %p2630_p0 }
  0x43   :  { %p2633_p3 = pnand %p2632_p2, %p2626_p13 }
  0x45   :  { %2636 = shalt.err (!%p2633_p3)
}
  0x46   :  { %63 = dma.hbm_to_vmem [thread:$0]  %s3201_s3, 64, %s61_s14, [#allocation10]  }
  0x47   :  { %2637 = dma.done.wait [#allocation5], 1024  }
  0x48   :  { %2638 = vsyncadd [#allocation5], 4294966272 }
  0x49   :  { %2639 = dma.done.wait [#allocation7], 10240  }
  0x4a   :  { %2640 = vsyncadd [#allocation7], 4294957056 }
  0x4b   :  { %2641 = dma.done.wait [#allocation10], 64  }
  0x4c   :  { %2642 = vsyncadd [#allocation10], 4294967232  ;;  %v2651_v1 = vmov 0.0   ;;  %v93_v2 = vld [vmem:[#allocation6 + $0x8] sm:$0xff]  ;;  %v95_v4 = vld [vmem:[#allocation6 + $0x18] sm:$0xff]  ;;  %vm130_vm0 = vcmask 261120  }
  0x4d   :  { %219 = vmatprep.mubr.f32.mxu0 %v2651_v1  ;;  %332 = vmatprep.mubr.f32.mxu1 %v2651_v1  ;;  %v97_v3 = vld [vmem:[#allocation6 + $0x28] sm:$0xff]  ;;  %v99_v6 = vld [vmem:[#allocation6 + $0x38] sm:$0xff]  ;;  %v92_v7 = vld [vmem:[#allocation6] sm:$0xff]  ;;  %vm1841_vm1 = vcmask 7168  }
  0x4e   :  { %v1868_v5 = vpack.c.bf16 %v97_v3, %v93_v2  ;;  %v96_v8 = vld [vmem:[#allocation6 + $0x20] sm:$0xff]  ;;  %v1876_v9 = vpack.c.bf16 %v99_v6, %v95_v4  ;;  %v94_v11 = vld [vmem:[#allocation6 + $0x10] sm:$0xff]  ;;  %v101_v13 = vld [vmem:[#allocation6 + $0x48] sm:$0xff] }
  0x4f   :  { %v1870_v10 = vpack.c.bf16 %v96_v8, %v92_v7  ;;  %v98_v12 = vld [vmem:[#allocation6 + $0x30] sm:$0xff]  ;;  %v105_v15 = vld [vmem:[#allocation6 + $0x68] sm:$0xff]  ;;  %v103_v16 = vld [vmem:[#allocation6 + $0x58] sm:$0xff] }
  0x50   :  { %1869 = vmatprep.subr.bf16.mxu0 %v1868_v5  ;;  %v1878_v14 = vpack.c.bf16 %v98_v12, %v94_v11  ;;  %v107_v17 = vld [vmem:[#allocation6 + $0x78] sm:$0xff]  ;;  %1877 = vmatprep.subr.bf16.mxu1 %v1876_v9  ;;  %v1872_v18 = vpack.c.bf16 %v105_v15, %v101_v13  ;;  %v100_v20 = vld [vmem:[#allocation6 + $0x40] sm:$0xff]  ;;  %v102_v22 = vld [vmem:[#allocation6 + $0x50] sm:$0xff] }
  0x51   :  { %1871 = vmatpush1.bf16.msra.mxu0 %v1870_v10  ;;  %v1880_v19 = vpack.c.bf16 %v107_v17, %v103_v16  ;;  %v104_v21 = vld [vmem:[#allocation6 + $0x60] sm:$0xff]  ;;  %v106_v24 = vld [vmem:[#allocation6 + $0x70] sm:$0xff]  ;;  %v420_v25 = vld [vmem:[#allocation8 + $0x8] sm:$0xff] }
  0x52   :  { %1879 = vmatpush1.bf16.msra.mxu1 %v1878_v14  ;;  %v1874_v23 = vpack.c.bf16 %v104_v21, %v100_v20  ;;  %1873 = vmatprep.subr.bf16.mxu0 %v1872_v18  ;;  %v1882_v26 = vpack.c.bf16 %v106_v24, %v102_v22  ;;  %v424_v27 = vld [vmem:[#allocation8 + $0x28] sm:$0xff]  ;;  %v422_v28 = vld [vmem:[#allocation8 + $0x18] sm:$0xff]  ;;  %v419_v32 = vld [vmem:[#allocation8] sm:$0xff] }
  0x53   :  { %1881 = vmatprep.subr.bf16.mxu1 %v1880_v19  ;;  %v426_v29 = vld [vmem:[#allocation8 + $0x38] sm:$0xff]  ;;  %v2756_v30 = vpack.c.bf16 %v424_v27, %v420_v25  ;;  %v423_v33 = vld [vmem:[#allocation8 + $0x20] sm:$0xff]  ;;  %v421_v34 = vld [vmem:[#allocation8 + $0x10] sm:$0xff] }
  0x54   :  { %v2758_v31 = vpack.c.bf16 %v426_v29, %v422_v28  ;;  %v84_v35 = vld [vmem:[#allocation4] sm:$0xff]  ;;  %v2760_v36 = vpack.c.bf16 %v423_v33, %v419_v32  ;;  %v425_v37 = vld [vmem:[#allocation8 + $0x30] sm:$0xff]  ;;  %v428_v38 = vld [vmem:[#allocation8 + $0x48] sm:$0xff] }
  0x55   :  { %1875 = vmatpush1.bf16.msra.mxu0 %v1874_v23  ;;  %v2763_v39 = vpack.c.bf16 %v425_v37, %v421_v34  ;;  %v432_v40 = vld [vmem:[#allocation8 + $0x68] sm:$0xff]  ;;  %v430_v41 = vld [vmem:[#allocation8 + $0x58] sm:$0xff]  ;;  %v427_v44 = vld [vmem:[#allocation8 + $0x40] sm:$0xff] }
  0x56   :  { %1883 = vmatpush1.bf16.msra.mxu1 %v1882_v26  ;;  %1885 = vmatprep.subr.bf16.mxu0 %v2756_v30  ;;  %v434_v42 = vld [vmem:[#allocation8 + $0x78] sm:$0xff]  ;;  %v2766_v43 = vpack.c.bf16 %v432_v40, %v428_v38  ;;  %v431_v45 = vld [vmem:[#allocation8 + $0x60] sm:$0xff]  ;;  %v429_v46 = vld [vmem:[#allocation8 + $0x50] sm:$0xff] }
  0x57   :  { %1917 = vmatprep.subr.bf16.mxu1 %v2758_v31  ;;  %v85_v47 = vld [vmem:[#allocation4 + $0x8] sm:$0xff]  ;;  %v2769_v48 = vpack.c.bf16 %v434_v42, %v430_v41  ;;  %v433_v49 = vld [vmem:[#allocation8 + $0x70] sm:$0xff]  ;;  %v2773_v51 = vpack.c.bf16 %v431_v45, %v427_v44  ;;  %v438_v53 = vld [vmem:[#allocation8 + $0x98] sm:$0xff] }
  0x58   :  { %1850 = vmatmul.mubr.msk.f32.vlgmr.msra.gmra.mrb[0].mxu0 %vm130_vm0, %v84_v35  ;;  %v436_v50 = vld [vmem:[#allocation8 + $0x88] sm:$0xff]  ;;  %v442_v54 = vld [vmem:[#allocation8 + $0xb8] sm:$0xff]  ;;  %v2777_v55 = vpack.c.bf16 %v433_v49, %v429_v46  ;;  %v435_v56 = vld [vmem:[#allocation8 + $0x80] sm:$0xff] }
  0x59   :  { %1858 = vmatmul.mubr.msk.f32.vlgmr.msra.gmra.mrb[0].mxu1 %vm130_vm0, %v84_v35  ;;  %1887 = vmatpush1.bf16.msra.mxu0 %v2760_v36  ;;  %v440_v52 = vld [vmem:[#allocation8 + $0xa8] sm:$0xff]  ;;  %v439_v57 = vld [vmem:[#allocation8 + $0xa0] sm:$0xff]  ;;  %v437_v59 = vld [vmem:[#allocation8 + $0x90] sm:$0xff]  ;;  %v2785_v61 = vpack.c.bf16 %v442_v54, %v438_v53 }
  0x5a   :  { %1919 = vmatpush1.bf16.msra.mxu1 %v2763_v39  ;;  %225 = vmatprep.mubr.f32.mxu0 %v2651_v1  ;;  %v2781_v58 = vpack.c.bf16 %v440_v52, %v436_v50  ;;  %v441_v60 = vld [vmem:[#allocation8 + $0xb0] sm:$0xff]  ;;  %v444_v62 = vld [vmem:[#allocation8 + $0xc8] sm:$0xff]  ;;  %v2789_v2 = vpack.c.bf16 %v439_v57, %v435_v56  ;;  %v446_v3 = vld [vmem:[#allocation8 + $0xd8] sm:$0xff] }
  0x5b   :  { %338 = vmatprep.mubr.f32.mxu1 %v2651_v1  ;;  %1889 = vmatprep.subr.bf16.mxu0 %v2766_v43  ;;  %v448_v63 = vld [vmem:[#allocation8 + $0xe8] sm:$0xff]  ;;  %v86_v0 = vld [vmem:[#allocation4 + $0x10] sm:$0xff]  ;;  %v450_v4 = vld [vmem:[#allocation8 + $0xf8] sm:$0xff]  ;;  %v2793_v5 = vpack.c.bf16 %v441_v60, %v437_v59 }
  0x5c   :  { %1851 = vmatmul.mubr.msk.f32.gmra.mrb[2].mxu0 %vm130_vm0, %v85_v47  ;;  %1921 = vmatprep.subr.bf16.mxu1 %v2769_v48  ;;  %v443_v6 = vld [vmem:[#allocation8 + $0xc0] sm:$0xff]  ;;  %v2797_v8 = vpack.c.bf16 %v448_v63, %v444_v62  ;;  %v445_v9 = vld [vmem:[#allocation8 + $0xd0] sm:$0xff]  ;;  %v2801_v11 = vpack.c.bf16 %v450_v4, %v446_v3  ;;  %v452_v12 = vld [vmem:[#allocation8 + $0x108] sm:$0xff] }
  0x5d   :  { %1859 = vmatmul.mubr.msk.f32.gmra.mrb[2].mxu1 %vm130_vm0, %v85_v47  ;;  %1891 = vmatpush1.bf16.msra.mxu0 %v2773_v51  ;;  %v447_v7 = vld [vmem:[#allocation8 + $0xe0] sm:$0xff]  ;;  %v449_v10 = vld [vmem:[#allocation8 + $0xf0] sm:$0xff]  ;;  %v456_v13 = vld [vmem:[#allocation8 + $0x128] sm:$0xff] }
  0x5e   :  { %1923 = vmatpush1.bf16.msra.mxu1 %v2777_v55  ;;  %231 = vmatprep.mubr.f32.mxu0 %v2651_v1  ;;  %v87_v14 = vld [vmem:[#allocation4 + $0x18] sm:$0xff]  ;;  %v2805_v15 = vpack.c.bf16 %v447_v7, %v443_v6  ;;  %v2809_v18 = vpack.c.bf16 %v449_v10, %v445_v9  ;;  %v451_v19 = vld [vmem:[#allocation8 + $0x100] sm:$0xff]  ;;  %v2813_v21 = vpack.c.bf16 %v456_v13, %v452_v12  ;;  %v453_v22 = vld [vmem:[#allocation8 + $0x110] sm:$0xff] }
  0x5f   :  { %344 = vmatprep.mubr.f32.mxu1 %v2651_v1  ;;  %1893 = vmatprep.subr.bf16.mxu0 %v2781_v58  ;;  %v454_v16 = vld [vmem:[#allocation8 + $0x118] sm:$0xff]  ;;  %v455_v20 = vld [vmem:[#allocation8 + $0x120] sm:$0xff]  ;;  %v457_v23 = vld [vmem:[#allocation8 + $0x130] sm:$0xff] }
  0x60   :  { %1852 = vmatmul.mubr.msk.f32.gmra.mrb[4].mxu0 %vm130_vm0, %v86_v0  ;;  %1925 = vmatprep.subr.bf16.mxu1 %v2785_v61  ;;  %v458_v17 = vld [vmem:[#allocation8 + $0x138] sm:$0xff]  ;;  %v460_v25 = vld [vmem:[#allocation8 + $0x148] sm:$0xff]  ;;  %v88_v27 = vld [vmem:[#allocation4 + $0x20] sm:$0xff]  ;;  %v2821_v28 = vpack.c.bf16 %v455_v20, %v451_v19  ;;  %v2825_v33 = vpack.c.bf16 %v457_v23, %v453_v22  ;;  %v110_v22 = vlaneseq }
  0x61   :  { %1860 = vmatmul.mubr.msk.f32.gmra.mrb[4].mxu1 %vm130_vm0, %v86_v0  ;;  %1895 = vmatpush1.bf16.msra.mxu0 %v2789_v2  ;;  %v2817_v24 = vpack.c.bf16 %v458_v17, %v454_v16  ;;  %v464_v26 = vld [vmem:[#allocation8 + $0x168] sm:$0xff]  ;;  %v462_v29 = vld [vmem:[#allocation8 + $0x158] sm:$0xff]  ;;  %v459_v34 = vld [vmem:[#allocation8 + $0x140] sm:$0xff] }
  0x62   :  { %1927 = vmatpush1.bf16.msra.mxu1 %v2793_v5  ;;  %237 = vmatprep.mubr.f32.mxu0 %v2651_v1  ;;  %v466_v32 = vld [vmem:[#allocation8 + $0x178] sm:$0xff]  ;;  %v463_v35 = vld [vmem:[#allocation8 + $0x160] sm:$0xff]  ;;  %v2829_v37 = vpack.c.bf16 %v464_v26, %v460_v25  ;;  %v461_v38 = vld [vmem:[#allocation8 + $0x150] sm:$0xff]  ;;  %v111_v23 = vshrl.u32 %v110_v22, 7 }
  0x63   :  { %350 = vmatprep.mubr.f32.mxu1 %v2651_v1  ;;  %1897 = vmatprep.subr.bf16.mxu0 %v2797_v8  ;;  %v465_v40 = vld [vmem:[#allocation8 + $0x170] sm:$0xff]  ;;  %v2833_v41 = vpack.c.bf16 %v466_v32, %v462_v29  ;;  %v468_v42 = vld [vmem:[#allocation8 + $0x188] sm:$0xff]  ;;  %v2837_v46 = vpack.c.bf16 %v463_v35, %v459_v34  ;;  %v470_v47 = vld [vmem:[#allocation8 + $0x198] sm:$0xff] }
  0x64   :  { %1853 = vmatmul.mubr.msk.f32.gmra.mrb[6].mxu0 %vm130_vm0, %v87_v14  ;;  %1929 = vmatprep.subr.bf16.mxu1 %v2801_v11  ;;  %v472_v44 = vld [vmem:[#allocation8 + $0x1a8] sm:$0xff]  ;;  %v474_v49 = vld [vmem:[#allocation8 + $0x1b8] sm:$0xff]  ;;  %v2841_v50 = vpack.c.bf16 %v465_v40, %v461_v38  ;;  %v467_v52 = vld [vmem:[#allocation8 + $0x180] sm:$0xff]  ;;  %v112_v25 = vsub.s32 0, %v111_v23  ;;  %v120_v32 = vsub.s32 2, %v111_v23 }
  0x65   :  { %1861 = vmatmul.mubr.msk.f32.gmra.mrb[6].mxu1 %vm130_vm0, %v87_v14  ;;  %1899 = vmatpush1.bf16.msra.mxu0 %v2805_v15  ;;  %v89_v45 = vld [vmem:[#allocation4 + $0x28] sm:$0xff]  ;;  %v471_v53 = vld [vmem:[#allocation8 + $0x1a0] sm:$0xff]  ;;  %v2845_v54 = vpack.c.bf16 %v472_v44, %v468_v42  ;;  %v469_v56 = vld [vmem:[#allocation8 + $0x190] sm:$0xff]  ;;  %v2849_v59 = vpack.c.bf16 %v474_v49, %v470_v47 }
  0x66   :  { %1931 = vmatpush1.bf16.msra.mxu1 %v2809_v18  ;;  %243 = vmatprep.mubr.f32.mxu0 %v2651_v1  ;;  %v473_v57 = vld [vmem:[#allocation8 + $0x1b0] sm:$0xff]  ;;  %v476_v60 = vld [vmem:[#allocation8 + $0x1c8] sm:$0xff]  ;;  %v2853_v0 = vpack.c.bf16 %v471_v53, %v467_v52  ;;  %v478_v3 = vld [vmem:[#allocation8 + $0x1d8] sm:$0xff] }
  0x67   :  { %356 = vmatprep.mubr.f32.mxu1 %v2651_v1  ;;  %1901 = vmatprep.subr.bf16.mxu0 %v2813_v21  ;;  %v480_v62 = vld [vmem:[#allocation8 + $0x1e8] sm:$0xff]  ;;  %v90_v63 = vld [vmem:[#allocation4 + $0x30] sm:$0xff]  ;;  %v482_v4 = vld [vmem:[#allocation8 + $0x1f8] sm:$0xff]  ;;  %v2857_v6 = vpack.c.bf16 %v473_v57, %v469_v56 }
  0x68   :  { %1854 = vmatmul.mubr.msk.f32.gmra.mrb[8].mxu0 %vm130_vm0, %v88_v27  ;;  %1933 = vmatprep.subr.bf16.mxu1 %v2817_v24  ;;  %v475_v7 = vld [vmem:[#allocation8 + $0x1c0] sm:$0xff]  ;;  %v2861_v10 = vpack.c.bf16 %v480_v62, %v476_v60  ;;  %v477_v12 = vld [vmem:[#allocation8 + $0x1d0] sm:$0xff]  ;;  %v2865_v14 = vpack.c.bf16 %v482_v4, %v478_v3  ;;  %v91_v16 = vld [vmem:[#allocation4 + $0x38] sm:$0xff] }
  0x69   :  { %1862 = vmatmul.mubr.msk.f32.gmra.mrb[8].mxu1 %vm130_vm0, %v88_v27  ;;  %1903 = vmatpush1.bf16.msra.mxu0 %v2821_v28  ;;  %v479_v9 = vld [vmem:[#allocation8 + $0x1e0] sm:$0xff]  ;;  %v481_v13 = vld [vmem:[#allocation8 + $0x1f0] sm:$0xff]  ;;  %v116_v27 = vsub.s32 1, %v111_v23 }
  0x6a   :  { %1935 = vmatpush1.bf16.msra.mxu1 %v2825_v33  ;;  %249 = vmatprep.mubr.f32.mxu0 %v2651_v1  ;;  %v2869_v17 = vpack.c.bf16 %v479_v9, %v475_v7  ;;  %v2873_v19 = vpack.c.bf16 %v481_v13, %v477_v12  ;;  %v413_v20 = vld [vmem:[%s3204_s6] sm:$0xff] }
  0x6b   :  { %362 = vmatprep.mubr.f32.mxu1 %v2651_v1  ;;  %1905 = vmatprep.subr.bf16.mxu0 %v2829_v37  ;;  %v108_v26 = vld [vmem:[#allocation9] sm:$0xf] }
  0x6c   :  { %1855 = vmatmul.mubr.msk.f32.gmra.mrb[10].mxu0 %vm130_vm0, %v89_v45  ;;  %1937 = vmatprep.subr.bf16.mxu1 %v2833_v41  ;;  %v2923_v29 = vrot.slane %v108_v26, %v112_v25  ;;  %v2925_v34 = vrot.slane %v108_v26, %v116_v27  ;;  %v2928_v40 = vrot.slane %v108_v26, %v120_v32  ;;  %v414_v12 = vld [vmem:[%s3205_s7] sm:$0xff] }
  0x6d   :  { %1863 = vmatmul.mubr.msk.f32.gmra.mrb[10].mxu1 %vm130_vm0, %v89_v45  ;;  %1907 = vmatpush1.bf16.msra.mxu0 %v2837_v46  ;;  %v124_v45 = vsub.s32 3, %v111_v23 }
  0x6e   :  { %1939 = vmatpush1.bf16.msra.mxu1 %v2841_v50  ;;  %255 = vmatprep.mubr.f32.mxu0 %v2651_v1 }
  0x6f   :  { %368 = vmatprep.mubr.f32.mxu1 %v2651_v1  ;;  %1909 = vmatprep.subr.bf16.mxu0 %v2845_v54  ;;  %v2932_v57 = vrot.slane %v108_v26, %v124_v45 }
  0x70   :  { %1856 = vmatmul.mubr.msk.f32.gmra.mrb[12].mxu0 %vm130_vm0, %v90_v63  ;;  %1941 = vmatprep.subr.bf16.mxu1 %v2849_v59 }
  0x71   :  { %1864 = vmatmul.mubr.msk.f32.gmra.mrb[12].mxu1 %vm130_vm0, %v90_v63  ;;  %1911 = vmatpush1.bf16.msra.mxu0 %v2853_v0 }
  0x72   :  { %1943 = vmatpush1.bf16.msra.mxu1 %v2857_v6  ;;  %261 = vmatprep.mubr.f32.mxu0 %v2651_v1 }
  0x73   :  { %374 = vmatprep.mubr.f32.mxu1 %v2651_v1  ;;  %1913 = vmatprep.subr.bf16.mxu0 %v2861_v10 }
  0x74   :  { %1857 = vmatmul.mubr.msk.f32.gmra.mrb[14].mxu0 %vm130_vm0, %v91_v16  ;;  %1945 = vmatprep.subr.bf16.mxu1 %v2865_v14 }
  0x75   :  { %1865 = vmatmul.mubr.msk.f32.gmra.mrb[14].mxu1 %vm130_vm0, %v91_v16  ;;  %1915 = vmatpush1.bf16.msra.mxu0 %v2869_v17 }
  0x76   :  { %1947 = vmatpush1.bf16.msra.mxu1 %v2873_v19  ;;  %547 = vmatprep.mubr.f32.mxu0 %v2651_v1 }
  0x77   :  { %618 = vmatprep.mubr.f32.mxu1 %v2651_v1  ;;  %1949 = vmatprep.subr.bf16.mxu0 %v2756_v30 }
  0x78   :  { %548 = vmatmul.mubr.f32.vlgmr.msra.gmra.mrb[0].mxu0 %v413_v20  ;;  %1981 = vmatprep.subr.bf16.mxu1 %v2758_v31 }
  0x79   :  { %619 = vmatmul.mubr.f32.vlgmr.msra.gmra.mrb[0].mxu1 %v413_v20  ;;  %1951 = vmatpush1.bf16.msra.mxu0 %v2760_v36 }
  0x7a   :  { %1983 = vmatpush1.bf16.msra.mxu1 %v2763_v39  ;;  %1953 = vmatprep.subr.bf16.mxu0 %v2766_v43 }
  0x7b   :  { %1985 = vmatprep.subr.bf16.mxu1 %v2769_v48  ;;  %715 = vmatprep.mubr.f32.mxu0 %v2651_v1 }
  0x7c   :  { %786 = vmatprep.mubr.f32.mxu1 %v2651_v1 }
  0x7d   :  { %1955 = vmatpush1.bf16.msra.mxu0 %v2773_v51 }
  0x7e   :  { %1987 = vmatpush1.bf16.msra.mxu1 %v2777_v55  ;;  %1957 = vmatprep.subr.bf16.mxu0 %v2781_v58 }
  0x7f   :  { %1989 = vmatprep.subr.bf16.mxu1 %v2785_v61 }
  0x81   :  { %1959 = vmatpush1.bf16.msra.mxu0 %v2789_v2 }
  0x82   :  { %1991 = vmatpush1.bf16.msra.mxu1 %v2793_v5  ;;  %1961 = vmatprep.subr.bf16.mxu0 %v2797_v8 }
  0x83   :  { %1993 = vmatprep.subr.bf16.mxu1 %v2801_v11 }
  0x85   :  { %1963 = vmatpush1.bf16.msra.mxu0 %v2805_v15 }
  0x86   :  { %1995 = vmatpush1.bf16.msra.mxu1 %v2809_v18  ;;  %1965 = vmatprep.subr.bf16.mxu0 %v2813_v21 }
  0x87   :  { %1997 = vmatprep.subr.bf16.mxu1 %v2817_v24 }
  0x89   :  { %1967 = vmatpush1.bf16.msra.mxu0 %v2821_v28 }
  0x8a   :  { %1999 = vmatpush1.bf16.msra.mxu1 %v2825_v33  ;;  %1969 = vmatprep.subr.bf16.mxu0 %v2829_v37 }
  0x8b   :  { %2001 = vmatprep.subr.bf16.mxu1 %v2833_v41 }
  0x8d   :  { %1971 = vmatpush1.bf16.msra.mxu0 %v2837_v46 }
  0x8e   :  { %2003 = vmatpush1.bf16.msra.mxu1 %v2841_v50  ;;  %1973 = vmatprep.subr.bf16.mxu0 %v2845_v54 }
  0x8f   :  { %2005 = vmatprep.subr.bf16.mxu1 %v2849_v59 }
  0x91   :  { %1975 = vmatpush1.bf16.msra.mxu0 %v2853_v0 }
  0x92   :  { %2007 = vmatpush1.bf16.msra.mxu1 %v2857_v6  ;;  %1977 = vmatprep.subr.bf16.mxu0 %v2861_v10 }
  0x93   :  { %2009 = vmatprep.subr.bf16.mxu1 %v2865_v14 }
  0x95   :  { %1979 = vmatpush1.bf16.msra.mxu0 %v2869_v17 }
  0x96   :  { %2011 = vmatpush1.bf16.msra.mxu1 %v2873_v19  ;;  %2013 = vmatprep.subr.bf16.mxu0 %v2756_v30 }
  0x97   :  { %2045 = vmatprep.subr.bf16.mxu1 %v2758_v31 }
 0x14b   :  { %v549_v35 = vpop.f32.mrb[0].mxu0 }
 0x14c   :  { %v2396_v38 = vadd.f32 %v549_v35, %v2923_v29  ;;  %v620_v42 = vpop.f32.mrb[0].mxu1  ;;  %v551_v44 = vpop.f32.mrb[1].mxu0 }
 0x14d   :  { %v2397_v47 = vadd.f32 %v551_v44, %v2925_v34  ;;  %v622_v49 = vpop.f32.mrb[1].mxu1  ;;  %v2412_v56 = vadd.f32 %v620_v42, %v2928_v40 }
 0x14e   :  { %v629_v52 = vmul.f32 0.5, %v2396_v38  ;;  %v2413_v60 = vadd.f32 %v622_v49, %v2932_v57 }
 0x14f   :  { %v633_v53 = vmul.f32 0.5, %v2397_v47 }
 0x150   :  { %2469 = vtanh.f32 %v629_v52  ;;  %v638_v62 = vmul.f32 0.5, %v2413_v60 }
 0x151   :  { %2471 = vtanh.f32 %v633_v53 }
 0x152   :  { %2473 = vtanh.f32 %v2412_v56 }
 0x153   :  { %2475 = vtanh.f32 %v638_v62 }
 0x15a   :  { %v2470_v63 = vpop.eup %2469 }
 0x15b   :  { %v2472_v3 = vpop.eup %2471  ;;  %v631_v4 = vmul.f32 0.5, %v2470_v63 }
 0x15c   :  { %v635_v7 = vmul.f32 0.5, %v2472_v3  ;;  %v2474_v13 = vpop.eup %2473 }
 0x15d   :  { %v632_v9 = vadd.f32 0.5, %v631_v4  ;;  %v2476_v25 = vpop.eup %2475 }
 0x15e   :  { %v636_v16 = vadd.f32 0.5, %v635_v7  ;;  %v640_v26 = vmul.f32 0.5, %v2476_v25 }
 0x15f   :  { %v643_v20 = vmul.f32 %v2474_v13, %v632_v9 }
 0x160   :  { %v642_v22 = vmul.f32 %v636_v16, %v414_v12  ;;  %v641_v27 = vadd.f32 0.5, %v640_v26 }
 0x162   :  { %v2938_v23 = vadd.f32 %v643_v20, %v642_v22 }
 0x164   :  { %2477 = vtanh.f32 %v2938_v23 }
 0x16e   :  { %v2478_v32 = vpop.eup %2477 }
 0x16f   :  { %v646_v35 = vmul.f32 %v2478_v32, %v641_v27 }
 0x171   :  { %716 = vmatmul.mubr.f32.vlgmr.msra.gmra.mrb[2].mxu0 %v646_v35  ;;  %787 = vmatmul.mubr.f32.vlgmr.msra.gmra.mrb[2].mxu1 %v646_v35 }
 0x172   :  { %2015 = vmatpush1.bf16.msra.mxu0 %v2760_v36  ;;  %2047 = vmatpush1.bf16.msra.mxu1 %v2763_v39 }
 0x173   :  { %2017 = vmatprep.subr.bf16.mxu0 %v2766_v43  ;;  %2049 = vmatprep.subr.bf16.mxu1 %v2769_v48 }
 0x174   :  { %883 = vmatprep.mubr.f32.mxu0 %v2651_v1  ;;  %954 = vmatprep.mubr.f32.mxu1 %v2651_v1 }
 0x176   :  { %2019 = vmatpush1.bf16.msra.mxu0 %v2773_v51  ;;  %2051 = vmatpush1.bf16.msra.mxu1 %v2777_v55 }
 0x177   :  { %2021 = vmatprep.subr.bf16.mxu0 %v2781_v58  ;;  %2053 = vmatprep.subr.bf16.mxu1 %v2785_v61 }
 0x17a   :  { %2023 = vmatpush1.bf16.msra.mxu0 %v2789_v2  ;;  %2055 = vmatpush1.bf16.msra.mxu1 %v2793_v5 }
 0x17b   :  { %2025 = vmatprep.subr.bf16.mxu0 %v2797_v8  ;;  %2057 = vmatprep.subr.bf16.mxu1 %v2801_v11 }
 0x17e   :  { %2027 = vmatpush1.bf16.msra.mxu0 %v2805_v15  ;;  %2059 = vmatpush1.bf16.msra.mxu1 %v2809_v18 }
 0x17f   :  { %2029 = vmatprep.subr.bf16.mxu0 %v2813_v21  ;;  %2061 = vmatprep.subr.bf16.mxu1 %v2817_v24 }
 0x182   :  { %2031 = vmatpush1.bf16.msra.mxu0 %v2821_v28  ;;  %2063 = vmatpush1.bf16.msra.mxu1 %v2825_v33 }
 0x183   :  { %2033 = vmatprep.subr.bf16.mxu0 %v2829_v37  ;;  %2065 = vmatprep.subr.bf16.mxu1 %v2833_v41 }
 0x186   :  { %2035 = vmatpush1.bf16.msra.mxu0 %v2837_v46  ;;  %2067 = vmatpush1.bf16.msra.mxu1 %v2841_v50 }
 0x187   :  { %2037 = vmatprep.subr.bf16.mxu0 %v2845_v54  ;;  %2069 = vmatprep.subr.bf16.mxu1 %v2849_v59 }
 0x18a   :  { %2039 = vmatpush1.bf16.msra.mxu0 %v2853_v0  ;;  %2071 = vmatpush1.bf16.msra.mxu1 %v2857_v6 }
 0x18b   :  { %2041 = vmatprep.subr.bf16.mxu0 %v2861_v10  ;;  %2073 = vmatprep.subr.bf16.mxu1 %v2865_v14 }
 0x18e   :  { %2043 = vmatpush1.bf16.msra.mxu0 %v2869_v17  ;;  %2075 = vmatpush1.bf16.msra.mxu1 %v2873_v19 }
 0x18f   :  { %2077 = vmatprep.subr.bf16.mxu0 %v2756_v30  ;;  %2109 = vmatprep.subr.bf16.mxu1 %v2758_v31 }
 0x244   :  { %v717_v38 = vpop.f32.mrb[2].mxu0  ;;  %v788_v42 = vpop.f32.mrb[2].mxu1 }
 0x245   :  { %v2398_v44 = vadd.f32 %v717_v38, %v2923_v29  ;;  %v719_v45 = vpop.f32.mrb[3].mxu0  ;;  %v790_v47 = vpop.f32.mrb[3].mxu1  ;;  %v2414_v56 = vadd.f32 %v788_v42, %v2928_v40 }
 0x246   :  { %v2399_v49 = vadd.f32 %v719_v45, %v2925_v34  ;;  %v2415_v60 = vadd.f32 %v790_v47, %v2932_v57 }
 0x247   :  { %v797_v52 = vmul.f32 0.5, %v2398_v44 }
 0x248   :  { %v801_v53 = vmul.f32 0.5, %v2399_v49  ;;  %v806_v62 = vmul.f32 0.5, %v2415_v60 }
 0x249   :  { %2479 = vtanh.f32 %v797_v52 }
 0x24a   :  { %2481 = vtanh.f32 %v801_v53 }
 0x24b   :  { %2483 = vtanh.f32 %v2414_v56 }
 0x24c   :  { %2485 = vtanh.f32 %v806_v62 }
 0x253   :  { %v2480_v63 = vpop.eup %2479 }
 0x254   :  { %v2482_v3 = vpop.eup %2481  ;;  %v799_v4 = vmul.f32 0.5, %v2480_v63 }
 0x255   :  { %v803_v7 = vmul.f32 0.5, %v2482_v3  ;;  %v2484_v12 = vpop.eup %2483 }
 0x256   :  { %v800_v9 = vadd.f32 0.5, %v799_v4  ;;  %v2486_v25 = vpop.eup %2485 }
 0x257   :  { %v804_v13 = vadd.f32 0.5, %v803_v7  ;;  %v808_v26 = vmul.f32 0.5, %v2486_v25 }
 0x258   :  { %v811_v16 = vmul.f32 %v2484_v12, %v800_v9 }
 0x259   :  { %v810_v20 = vmul.f32 %v804_v13, %v2938_v23  ;;  %v809_v27 = vadd.f32 0.5, %v808_v26 }
 0x25b   :  { %v2980_v22 = vadd.f32 %v811_v16, %v810_v20 }
 0x25d   :  { %2487 = vtanh.f32 %v2980_v22 }
 0x267   :  { %v2488_v32 = vpop.eup %2487 }
 0x268   :  { %v814_v35 = vmul.f32 %v2488_v32, %v809_v27 }
 0x26a   :  { %884 = vmatmul.mubr.f32.vlgmr.msra.gmra.mrb[4].mxu0 %v814_v35  ;;  %955 = vmatmul.mubr.f32.vlgmr.msra.gmra.mrb[4].mxu1 %v814_v35 }
 0x26b   :  { %2079 = vmatpush1.bf16.msra.mxu0 %v2760_v36  ;;  %2111 = vmatpush1.bf16.msra.mxu1 %v2763_v39 }
 0x26c   :  { %2081 = vmatprep.subr.bf16.mxu0 %v2766_v43  ;;  %2113 = vmatprep.subr.bf16.mxu1 %v2769_v48 }
 0x26d   :  { %1051 = vmatprep.mubr.f32.mxu0 %v2651_v1  ;;  %1122 = vmatprep.mubr.f32.mxu1 %v2651_v1 }
 0x26f   :  { %2083 = vmatpush1.bf16.msra.mxu0 %v2773_v51  ;;  %2115 = vmatpush1.bf16.msra.mxu1 %v2777_v55 }
 0x270   :  { %2085 = vmatprep.subr.bf16.mxu0 %v2781_v58  ;;  %2117 = vmatprep.subr.bf16.mxu1 %v2785_v61 }
 0x273   :  { %2087 = vmatpush1.bf16.msra.mxu0 %v2789_v2  ;;  %2119 = vmatpush1.bf16.msra.mxu1 %v2793_v5 }
 0x274   :  { %2089 = vmatprep.subr.bf16.mxu0 %v2797_v8  ;;  %2121 = vmatprep.subr.bf16.mxu1 %v2801_v11 }
 0x277   :  { %2091 = vmatpush1.bf16.msra.mxu0 %v2805_v15  ;;  %2123 = vmatpush1.bf16.msra.mxu1 %v2809_v18 }
 0x278   :  { %2093 = vmatprep.subr.bf16.mxu0 %v2813_v21  ;;  %2125 = vmatprep.subr.bf16.mxu1 %v2817_v24 }
 0x27b   :  { %2095 = vmatpush1.bf16.msra.mxu0 %v2821_v28  ;;  %2127 = vmatpush1.bf16.msra.mxu1 %v2825_v33 }
 0x27c   :  { %2097 = vmatprep.subr.bf16.mxu0 %v2829_v37  ;;  %2129 = vmatprep.subr.bf16.mxu1 %v2833_v41 }
 0x27f   :  { %2099 = vmatpush1.bf16.msra.mxu0 %v2837_v46  ;;  %2131 = vmatpush1.bf16.msra.mxu1 %v2841_v50 }
 0x280   :  { %2101 = vmatprep.subr.bf16.mxu0 %v2845_v54  ;;  %2133 = vmatprep.subr.bf16.mxu1 %v2849_v59 }
 0x283   :  { %2103 = vmatpush1.bf16.msra.mxu0 %v2853_v0  ;;  %2135 = vmatpush1.bf16.msra.mxu1 %v2857_v6 }
 0x284   :  { %2105 = vmatprep.subr.bf16.mxu0 %v2861_v10  ;;  %2137 = vmatprep.subr.bf16.mxu1 %v2865_v14 }
 0x287   :  { %2107 = vmatpush1.bf16.msra.mxu0 %v2869_v17  ;;  %2139 = vmatpush1.bf16.msra.mxu1 %v2873_v19 }
 0x288   :  { %2141 = vmatprep.subr.bf16.mxu0 %v2756_v30  ;;  %2173 = vmatprep.subr.bf16.mxu1 %v2758_v31 }
 0x33d   :  { %v885_v23 = vpop.f32.mrb[4].mxu0  ;;  %v956_v38 = vpop.f32.mrb[4].mxu1 }
 0x33e   :  { %v2400_v42 = vadd.f32 %v885_v23, %v2923_v29  ;;  %v887_v44 = vpop.f32.mrb[5].mxu0  ;;  %v958_v45 = vpop.f32.mrb[5].mxu1  ;;  %v2416_v53 = vadd.f32 %v956_v38, %v2928_v40 }
 0x33f   :  { %v2401_v47 = vadd.f32 %v887_v44, %v2925_v34  ;;  %v2417_v56 = vadd.f32 %v958_v45, %v2932_v57 }
 0x340   :  { %v965_v49 = vmul.f32 0.5, %v2400_v42 }
 0x341   :  { %v969_v52 = vmul.f32 0.5, %v2401_v47  ;;  %v974_v60 = vmul.f32 0.5, %v2417_v56 }
 0x342   :  { %2489 = vtanh.f32 %v965_v49 }
 0x343   :  { %2491 = vtanh.f32 %v969_v52 }
 0x344   :  { %2493 = vtanh.f32 %v2416_v53 }
 0x345   :  { %2495 = vtanh.f32 %v974_v60 }
 0x34c   :  { %v2490_v62 = vpop.eup %2489 }
 0x34d   :  { %v2492_v63 = vpop.eup %2491  ;;  %v967_v3 = vmul.f32 0.5, %v2490_v62 }
 0x34e   :  { %v971_v4 = vmul.f32 0.5, %v2492_v63  ;;  %v2494_v9 = vpop.eup %2493 }
 0x34f   :  { %v968_v7 = vadd.f32 0.5, %v967_v3  ;;  %v2496_v25 = vpop.eup %2495 }
 0x350   :  { %v972_v12 = vadd.f32 0.5, %v971_v4  ;;  %v976_v26 = vmul.f32 0.5, %v2496_v25 }
 0x351   :  { %v979_v13 = vmul.f32 %v2494_v9, %v968_v7 }
 0x352   :  { %v978_v16 = vmul.f32 %v972_v12, %v2980_v22  ;;  %v977_v27 = vadd.f32 0.5, %v976_v26 }
 0x354   :  { %v3022_v20 = vadd.f32 %v979_v13, %v978_v16 }
 0x356   :  { %2497 = vtanh.f32 %v3022_v20 }
 0x360   :  { %v2498_v32 = vpop.eup %2497 }
 0x361   :  { %v982_v35 = vmul.f32 %v2498_v32, %v977_v27 }
 0x363   :  { %1052 = vmatmul.mubr.f32.vlgmr.msra.gmra.mrb[6].mxu0 %v982_v35  ;;  %1123 = vmatmul.mubr.f32.vlgmr.msra.gmra.mrb[6].mxu1 %v982_v35 }
 0x364   :  { %2143 = vmatpush1.bf16.msra.mxu0 %v2760_v36  ;;  %2175 = vmatpush1.bf16.msra.mxu1 %v2763_v39 }
 0x365   :  { %2145 = vmatprep.subr.bf16.mxu0 %v2766_v43  ;;  %2177 = vmatprep.subr.bf16.mxu1 %v2769_v48 }
 0x366   :  { %1219 = vmatprep.mubr.f32.mxu0 %v2651_v1  ;;  %1290 = vmatprep.mubr.f32.mxu1 %v2651_v1 }
 0x368   :  { %2147 = vmatpush1.bf16.msra.mxu0 %v2773_v51  ;;  %2179 = vmatpush1.bf16.msra.mxu1 %v2777_v55 }
 0x369   :  { %2149 = vmatprep.subr.bf16.mxu0 %v2781_v58  ;;  %2181 = vmatprep.subr.bf16.mxu1 %v2785_v61 }
 0x36c   :  { %2151 = vmatpush1.bf16.msra.mxu0 %v2789_v2  ;;  %2183 = vmatpush1.bf16.msra.mxu1 %v2793_v5 }
 0x36d   :  { %2153 = vmatprep.subr.bf16.mxu0 %v2797_v8  ;;  %2185 = vmatprep.subr.bf16.mxu1 %v2801_v11 }
 0x370   :  { %2155 = vmatpush1.bf16.msra.mxu0 %v2805_v15  ;;  %2187 = vmatpush1.bf16.msra.mxu1 %v2809_v18 }
 0x371   :  { %2157 = vmatprep.subr.bf16.mxu0 %v2813_v21  ;;  %2189 = vmatprep.subr.bf16.mxu1 %v2817_v24 }
 0x374   :  { %2159 = vmatpush1.bf16.msra.mxu0 %v2821_v28  ;;  %2191 = vmatpush1.bf16.msra.mxu1 %v2825_v33 }
 0x375   :  { %2161 = vmatprep.subr.bf16.mxu0 %v2829_v37  ;;  %2193 = vmatprep.subr.bf16.mxu1 %v2833_v41 }
 0x378   :  { %2163 = vmatpush1.bf16.msra.mxu0 %v2837_v46  ;;  %2195 = vmatpush1.bf16.msra.mxu1 %v2841_v50 }
 0x379   :  { %2165 = vmatprep.subr.bf16.mxu0 %v2845_v54  ;;  %2197 = vmatprep.subr.bf16.mxu1 %v2849_v59 }
 0x37c   :  { %2167 = vmatpush1.bf16.msra.mxu0 %v2853_v0  ;;  %2199 = vmatpush1.bf16.msra.mxu1 %v2857_v6 }
 0x37d   :  { %2169 = vmatprep.subr.bf16.mxu0 %v2861_v10  ;;  %2201 = vmatprep.subr.bf16.mxu1 %v2865_v14 }
 0x380   :  { %2171 = vmatpush1.bf16.msra.mxu0 %v2869_v17  ;;  %2203 = vmatpush1.bf16.msra.mxu1 %v2873_v19 }
 0x381   :  { %2205 = vmatprep.subr.bf16.mxu0 %v2756_v30  ;;  %2237 = vmatprep.subr.bf16.mxu1 %v2758_v31 }
 0x436   :  { %v1053_v22 = vpop.f32.mrb[6].mxu0  ;;  %v1124_v23 = vpop.f32.mrb[6].mxu1 }
 0x437   :  { %v2402_v38 = vadd.f32 %v1053_v22, %v2923_v29  ;;  %v1055_v42 = vpop.f32.mrb[7].mxu0  ;;  %v1126_v44 = vpop.f32.mrb[7].mxu1  ;;  %v2418_v52 = vadd.f32 %v1124_v23, %v2928_v40 }
 0x438   :  { %v2403_v45 = vadd.f32 %v1055_v42, %v2925_v34  ;;  %v2419_v53 = vadd.f32 %v1126_v44, %v2932_v57 }
 0x439   :  { %v1133_v47 = vmul.f32 0.5, %v2402_v38 }
 0x43a   :  { %v1137_v49 = vmul.f32 0.5, %v2403_v45  ;;  %v1142_v56 = vmul.f32 0.5, %v2419_v53 }
 0x43b   :  { %2499 = vtanh.f32 %v1133_v47 }
 0x43c   :  { %2501 = vtanh.f32 %v1137_v49 }
 0x43d   :  { %2503 = vtanh.f32 %v2418_v52 }
 0x43e   :  { %2505 = vtanh.f32 %v1142_v56 }
 0x445   :  { %v2500_v60 = vpop.eup %2499 }
 0x446   :  { %v2502_v62 = vpop.eup %2501  ;;  %v1135_v63 = vmul.f32 0.5, %v2500_v60 }
 0x447   :  { %v1139_v3 = vmul.f32 0.5, %v2502_v62  ;;  %v2504_v7 = vpop.eup %2503 }
 0x448   :  { %v1136_v4 = vadd.f32 0.5, %v1135_v63  ;;  %v2506_v25 = vpop.eup %2505 }
 0x449   :  { %v1140_v9 = vadd.f32 0.5, %v1139_v3  ;;  %v1144_v26 = vmul.f32 0.5, %v2506_v25 }
 0x44a   :  { %v1147_v12 = vmul.f32 %v2504_v7, %v1136_v4 }
 0x44b   :  { %v1146_v13 = vmul.f32 %v1140_v9, %v3022_v20  ;;  %v1145_v27 = vadd.f32 0.5, %v1144_v26 }
 0x44d   :  { %v3064_v16 = vadd.f32 %v1147_v12, %v1146_v13 }
 0x44f   :  { %2507 = vtanh.f32 %v3064_v16 }
 0x459   :  { %v2508_v32 = vpop.eup %2507 }
 0x45a   :  { %v1150_v35 = vmul.f32 %v2508_v32, %v1145_v27 }
 0x45c   :  { %1220 = vmatmul.mubr.f32.vlgmr.msra.gmra.mrb[8].mxu0 %v1150_v35  ;;  %1291 = vmatmul.mubr.f32.vlgmr.msra.gmra.mrb[8].mxu1 %v1150_v35 }
 0x45d   :  { %2207 = vmatpush1.bf16.msra.mxu0 %v2760_v36  ;;  %2239 = vmatpush1.bf16.msra.mxu1 %v2763_v39 }
 0x45e   :  { %2209 = vmatprep.subr.bf16.mxu0 %v2766_v43  ;;  %2241 = vmatprep.subr.bf16.mxu1 %v2769_v48 }
 0x45f   :  { %1387 = vmatprep.mubr.f32.mxu0 %v2651_v1  ;;  %1458 = vmatprep.mubr.f32.mxu1 %v2651_v1 }
 0x461   :  { %2211 = vmatpush1.bf16.msra.mxu0 %v2773_v51  ;;  %2243 = vmatpush1.bf16.msra.mxu1 %v2777_v55 }
 0x462   :  { %2213 = vmatprep.subr.bf16.mxu0 %v2781_v58  ;;  %2245 = vmatprep.subr.bf16.mxu1 %v2785_v61 }
 0x465   :  { %2215 = vmatpush1.bf16.msra.mxu0 %v2789_v2  ;;  %2247 = vmatpush1.bf16.msra.mxu1 %v2793_v5 }
 0x466   :  { %2217 = vmatprep.subr.bf16.mxu0 %v2797_v8  ;;  %2249 = vmatprep.subr.bf16.mxu1 %v2801_v11 }
 0x469   :  { %2219 = vmatpush1.bf16.msra.mxu0 %v2805_v15  ;;  %2251 = vmatpush1.bf16.msra.mxu1 %v2809_v18 }
 0x46a   :  { %2221 = vmatprep.subr.bf16.mxu0 %v2813_v21  ;;  %2253 = vmatprep.subr.bf16.mxu1 %v2817_v24 }
 0x46d   :  { %2223 = vmatpush1.bf16.msra.mxu0 %v2821_v28  ;;  %2255 = vmatpush1.bf16.msra.mxu1 %v2825_v33 }
 0x46e   :  { %2225 = vmatprep.subr.bf16.mxu0 %v2829_v37  ;;  %2257 = vmatprep.subr.bf16.mxu1 %v2833_v41 }
 0x471   :  { %2227 = vmatpush1.bf16.msra.mxu0 %v2837_v46  ;;  %2259 = vmatpush1.bf16.msra.mxu1 %v2841_v50 }
 0x472   :  { %2229 = vmatprep.subr.bf16.mxu0 %v2845_v54  ;;  %2261 = vmatprep.subr.bf16.mxu1 %v2849_v59 }
 0x475   :  { %2231 = vmatpush1.bf16.msra.mxu0 %v2853_v0  ;;  %2263 = vmatpush1.bf16.msra.mxu1 %v2857_v6 }
 0x476   :  { %2233 = vmatprep.subr.bf16.mxu0 %v2861_v10  ;;  %2265 = vmatprep.subr.bf16.mxu1 %v2865_v14 }
 0x479   :  { %2235 = vmatpush1.bf16.msra.mxu0 %v2869_v17  ;;  %2267 = vmatpush1.bf16.msra.mxu1 %v2873_v19 }
 0x47a   :  { %2269 = vmatprep.subr.bf16.mxu0 %v2756_v30  ;;  %2301 = vmatprep.subr.bf16.mxu1 %v2758_v31 }
 0x52f   :  { %v1221_v20 = vpop.f32.mrb[8].mxu0  ;;  %v1292_v22 = vpop.f32.mrb[8].mxu1 }
 0x530   :  { %v2404_v23 = vadd.f32 %v1221_v20, %v2923_v29  ;;  %v1223_v38 = vpop.f32.mrb[9].mxu0  ;;  %v1294_v42 = vpop.f32.mrb[9].mxu1  ;;  %v2420_v49 = vadd.f32 %v1292_v22, %v2928_v40 }
 0x531   :  { %v2405_v44 = vadd.f32 %v1223_v38, %v2925_v34  ;;  %v2421_v52 = vadd.f32 %v1294_v42, %v2932_v57 }
 0x532   :  { %v1301_v45 = vmul.f32 0.5, %v2404_v23 }
 0x533   :  { %v1305_v47 = vmul.f32 0.5, %v2405_v44  ;;  %v1310_v53 = vmul.f32 0.5, %v2421_v52 }
 0x534   :  { %2509 = vtanh.f32 %v1301_v45 }
 0x535   :  { %2511 = vtanh.f32 %v1305_v47 }
 0x536   :  { %2513 = vtanh.f32 %v2420_v49 }
 0x537   :  { %2515 = vtanh.f32 %v1310_v53 }
 0x53e   :  { %v2510_v56 = vpop.eup %2509 }
 0x53f   :  { %v2512_v60 = vpop.eup %2511  ;;  %v1303_v62 = vmul.f32 0.5, %v2510_v56 }
 0x540   :  { %v1307_v63 = vmul.f32 0.5, %v2512_v60  ;;  %v2514_v4 = vpop.eup %2513 }
 0x541   :  { %v1304_v3 = vadd.f32 0.5, %v1303_v62  ;;  %v2516_v25 = vpop.eup %2515 }
 0x542   :  { %v1308_v7 = vadd.f32 0.5, %v1307_v63  ;;  %v1312_v26 = vmul.f32 0.5, %v2516_v25 }
 0x543   :  { %v1315_v9 = vmul.f32 %v2514_v4, %v1304_v3 }
 0x544   :  { %v1314_v12 = vmul.f32 %v1308_v7, %v3064_v16  ;;  %v1313_v27 = vadd.f32 0.5, %v1312_v26 }
 0x546   :  { %v3106_v13 = vadd.f32 %v1315_v9, %v1314_v12 }
 0x548   :  { %2517 = vtanh.f32 %v3106_v13 }
 0x552   :  { %v2518_v32 = vpop.eup %2517 }
 0x553   :  { %v1318_v35 = vmul.f32 %v2518_v32, %v1313_v27 }
 0x555   :  { %1388 = vmatmul.mubr.f32.vlgmr.msra.gmra.mrb[10].mxu0 %v1318_v35  ;;  %1459 = vmatmul.mubr.f32.vlgmr.msra.gmra.mrb[10].mxu1 %v1318_v35 }
 0x556   :  { %2271 = vmatpush1.bf16.msra.mxu0 %v2760_v36  ;;  %2303 = vmatpush1.bf16.msra.mxu1 %v2763_v39 }
 0x557   :  { %2273 = vmatprep.subr.bf16.mxu0 %v2766_v43  ;;  %2305 = vmatprep.subr.bf16.mxu1 %v2769_v48 }
 0x558   :  { %1555 = vmatprep.mubr.f32.mxu0 %v2651_v1  ;;  %1626 = vmatprep.mubr.f32.mxu1 %v2651_v1 }
 0x55a   :  { %2275 = vmatpush1.bf16.msra.mxu0 %v2773_v51  ;;  %2307 = vmatpush1.bf16.msra.mxu1 %v2777_v55 }
 0x55b   :  { %2277 = vmatprep.subr.bf16.mxu0 %v2781_v58  ;;  %2309 = vmatprep.subr.bf16.mxu1 %v2785_v61 }
 0x55e   :  { %2279 = vmatpush1.bf16.msra.mxu0 %v2789_v2  ;;  %2311 = vmatpush1.bf16.msra.mxu1 %v2793_v5 }
 0x55f   :  { %2281 = vmatprep.subr.bf16.mxu0 %v2797_v8  ;;  %2313 = vmatprep.subr.bf16.mxu1 %v2801_v11 }
 0x562   :  { %2283 = vmatpush1.bf16.msra.mxu0 %v2805_v15  ;;  %2315 = vmatpush1.bf16.msra.mxu1 %v2809_v18 }
 0x563   :  { %2285 = vmatprep.subr.bf16.mxu0 %v2813_v21  ;;  %2317 = vmatprep.subr.bf16.mxu1 %v2817_v24 }
 0x566   :  { %2287 = vmatpush1.bf16.msra.mxu0 %v2821_v28  ;;  %2319 = vmatpush1.bf16.msra.mxu1 %v2825_v33 }
 0x567   :  { %2289 = vmatprep.subr.bf16.mxu0 %v2829_v37  ;;  %2321 = vmatprep.subr.bf16.mxu1 %v2833_v41 }
 0x56a   :  { %2291 = vmatpush1.bf16.msra.mxu0 %v2837_v46  ;;  %2323 = vmatpush1.bf16.msra.mxu1 %v2841_v50 }
 0x56b   :  { %2293 = vmatprep.subr.bf16.mxu0 %v2845_v54  ;;  %2325 = vmatprep.subr.bf16.mxu1 %v2849_v59 }
 0x56e   :  { %2295 = vmatpush1.bf16.msra.mxu0 %v2853_v0  ;;  %2327 = vmatpush1.bf16.msra.mxu1 %v2857_v6 }
 0x56f   :  { %2297 = vmatprep.subr.bf16.mxu0 %v2861_v10  ;;  %2329 = vmatprep.subr.bf16.mxu1 %v2865_v14 }
 0x572   :  { %2299 = vmatpush1.bf16.msra.mxu0 %v2869_v17  ;;  %2331 = vmatpush1.bf16.msra.mxu1 %v2873_v19 }
 0x573   :  { %2333 = vmatprep.subr.bf16.mxu0 %v2756_v30  ;;  %2365 = vmatprep.subr.bf16.mxu1 %v2758_v31 }
 0x628   :  { %v1389_v16 = vpop.f32.mrb[10].mxu0  ;;  %v1460_v20 = vpop.f32.mrb[10].mxu1 }
 0x629   :  { %v2406_v22 = vadd.f32 %v1389_v16, %v2923_v29  ;;  %v1391_v23 = vpop.f32.mrb[11].mxu0  ;;  %v1462_v38 = vpop.f32.mrb[11].mxu1  ;;  %v2422_v47 = vadd.f32 %v1460_v20, %v2928_v40 }
 0x62a   :  { %v2407_v42 = vadd.f32 %v1391_v23, %v2925_v34  ;;  %v2423_v49 = vadd.f32 %v1462_v38, %v2932_v57 }
 0x62b   :  { %v1469_v44 = vmul.f32 0.5, %v2406_v22 }
 0x62c   :  { %v1473_v45 = vmul.f32 0.5, %v2407_v42  ;;  %v1478_v30 = vmul.f32 0.5, %v2423_v49 }
 0x62d   :  { %2519 = vtanh.f32 %v1469_v44 }
 0x62e   :  { %2521 = vtanh.f32 %v1473_v45 }
 0x62f   :  { %2523 = vtanh.f32 %v2422_v47 }
 0x630   :  { %2525 = vtanh.f32 %v1478_v30 }
 0x637   :  { %v2520_v52 = vpop.eup %2519 }
 0x638   :  { %v2522_v31 = vpop.eup %2521  ;;  %v1471_v53 = vmul.f32 0.5, %v2520_v52 }
 0x639   :  { %v1475_v56 = vmul.f32 0.5, %v2522_v31  ;;  %v2524_v62 = vpop.eup %2523 }
 0x63a   :  { %v1472_v60 = vadd.f32 0.5, %v1471_v53  ;;  %v2526_v9 = vpop.eup %2525 }
 0x63b   :  { %v1476_v63 = vadd.f32 0.5, %v1475_v56  ;;  %v1480_v12 = vmul.f32 0.5, %v2526_v9 }
 0x63c   :  { %v1483_v3 = vmul.f32 %v2524_v62, %v1472_v60  ;;  %v1867_v62 = vld [vmem:[#allocation3] ss:$0 sm:$0xff] }
 0x63d   :  { %v1482_v4 = vmul.f32 %v1476_v63, %v3106_v13  ;;  %v1481_v25 = vadd.f32 0.5, %v1480_v12 }
 0x63f   :  { %v3148_v7 = vadd.f32 %v1483_v3, %v1482_v4 }
 0x641   :  { %2527 = vtanh.f32 %v3148_v7 }
 0x64b   :  { %v2528_v26 = vpop.eup %2527 }
 0x64c   :  { %v1486_v27 = vmul.f32 %v2528_v26, %v1481_v25 }
 0x64e   :  { %1556 = vmatmul.mubr.f32.vlgmr.msra.gmra.mrb[12].mxu0 %v1486_v27  ;;  %1627 = vmatmul.mubr.f32.vlgmr.msra.gmra.mrb[12].mxu1 %v1486_v27 }
 0x64f   :  { %2335 = vmatpush1.bf16.msra.mxu0 %v2760_v36  ;;  %2367 = vmatpush1.bf16.msra.mxu1 %v2763_v39 }
 0x650   :  { %2337 = vmatprep.subr.bf16.mxu0 %v2766_v43  ;;  %2369 = vmatprep.subr.bf16.mxu1 %v2769_v48 }
 0x651   :  { %1723 = vmatprep.mubr.f32.mxu0 %v2651_v1  ;;  %1794 = vmatprep.mubr.f32.mxu1 %v2651_v1 }
 0x653   :  { %2339 = vmatpush1.bf16.msra.mxu0 %v2773_v51  ;;  %2371 = vmatpush1.bf16.msra.mxu1 %v2777_v55 }
 0x654   :  { %2341 = vmatprep.subr.bf16.mxu0 %v2781_v58  ;;  %2373 = vmatprep.subr.bf16.mxu1 %v2785_v61 }
 0x657   :  { %2343 = vmatpush1.bf16.msra.mxu0 %v2789_v2  ;;  %2375 = vmatpush1.bf16.msra.mxu1 %v2793_v5 }
 0x658   :  { %2345 = vmatprep.subr.bf16.mxu0 %v2797_v8  ;;  %2377 = vmatprep.subr.bf16.mxu1 %v2801_v11 }
 0x65b   :  { %2347 = vmatpush1.bf16.msra.mxu0 %v2805_v15  ;;  %2379 = vmatpush1.bf16.msra.mxu1 %v2809_v18 }
 0x65c   :  { %2349 = vmatprep.subr.bf16.mxu0 %v2813_v21  ;;  %2381 = vmatprep.subr.bf16.mxu1 %v2817_v24 }
 0x65f   :  { %2351 = vmatpush1.bf16.msra.mxu0 %v2821_v28  ;;  %2383 = vmatpush1.bf16.msra.mxu1 %v2825_v33 }
 0x660   :  { %2353 = vmatprep.subr.bf16.mxu0 %v2829_v37  ;;  %2385 = vmatprep.subr.bf16.mxu1 %v2833_v41 }
 0x663   :  { %2355 = vmatpush1.bf16.msra.mxu0 %v2837_v46  ;;  %2387 = vmatpush1.bf16.msra.mxu1 %v2841_v50 }
 0x664   :  { %2357 = vmatprep.subr.bf16.mxu0 %v2845_v54  ;;  %2389 = vmatprep.subr.bf16.mxu1 %v2849_v59 }
 0x667   :  { %2359 = vmatpush1.bf16.msra.mxu0 %v2853_v0  ;;  %2391 = vmatpush1.bf16.msra.mxu1 %v2857_v6 }
 0x668   :  { %2361 = vmatprep.subr.bf16.mxu0 %v2861_v10  ;;  %2393 = vmatprep.subr.bf16.mxu1 %v2865_v14 }
 0x66b   :  { %2363 = vmatpush1.bf16.msra.mxu0 %v2869_v17  ;;  %2395 = vmatpush1.bf16.msra.mxu1 %v2873_v19 }
 0x721   :  { %v1557_v1 = vpop.f32.mrb[12].mxu0  ;;  %v1628_v36 = vpop.f32.mrb[12].mxu1 }
 0x722   :  { %v2408_v39 = vadd.f32 %v1557_v1, %v2923_v29  ;;  %v1559_v43 = vpop.f32.mrb[13].mxu0  ;;  %v1630_v48 = vpop.f32.mrb[13].mxu1  ;;  %v2424_v61 = vadd.f32 %v1628_v36, %v2928_v40 }
 0x723   :  { %v2409_v51 = vadd.f32 %v1559_v43, %v2925_v34  ;;  %v2425_v2 = vadd.f32 %v1630_v48, %v2932_v57 }
 0x724   :  { %v1637_v55 = vmul.f32 0.5, %v2408_v39 }
 0x725   :  { %v1641_v58 = vmul.f32 0.5, %v2409_v51  ;;  %v1646_v5 = vmul.f32 0.5, %v2425_v2 }
 0x726   :  { %2529 = vtanh.f32 %v1637_v55 }
 0x727   :  { %2531 = vtanh.f32 %v1641_v58 }
 0x728   :  { %2533 = vtanh.f32 %v2424_v61 }
 0x729   :  { %2535 = vtanh.f32 %v1646_v5 }
 0x730   :  { %v2530_v8 = vpop.eup %2529 }
 0x731   :  { %v2532_v11 = vpop.eup %2531  ;;  %v1639_v15 = vmul.f32 0.5, %v2530_v8 }
 0x732   :  { %v1643_v18 = vmul.f32 0.5, %v2532_v11  ;;  %v2534_v24 = vpop.eup %2533 }
 0x733   :  { %v1640_v21 = vadd.f32 0.5, %v1639_v15  ;;  %v2536_v46 = vpop.eup %2535 }
 0x734   :  { %v1644_v28 = vadd.f32 0.5, %v1643_v18  ;;  %v1648_v50 = vmul.f32 0.5, %v2536_v46 }
 0x735   :  { %v1651_v33 = vmul.f32 %v2534_v24, %v1640_v21 }
 0x736   :  { %v1650_v37 = vmul.f32 %v1644_v28, %v3148_v7  ;;  %v1649_v54 = vadd.f32 0.5, %v1648_v50 }
 0x738   :  { %v1652_v41 = vadd.f32 %v1651_v33, %v1650_v37 }
 0x73a   :  { %2537 = vtanh.f32 %v1652_v41 }
 0x744   :  { %v2538_v59 = vpop.eup %2537 }
 0x745   :  { %v1654_v0 = vmul.f32 %v2538_v59, %v1649_v54 }
 0x747   :  { %1724 = vmatmul.mubr.f32.vlgmr.msra.gmra.mrb[14].mxu0 %v1654_v0  ;;  %1795 = vmatmul.mubr.f32.vlgmr.msra.gmra.mrb[14].mxu1 %v1654_v0 }
 0x81a   :  { %v1725_v6 = vpop.f32.mrb[14].mxu0  ;;  %v1796_v10 = vpop.f32.mrb[14].mxu1 }
 0x81b   :  { %v2410_v14 = vadd.f32 %v1725_v6, %v2923_v29  ;;  %v1727_v17 = vpop.f32.mrb[15].mxu0  ;;  %v1798_v19 = vpop.f32.mrb[15].mxu1  ;;  %v2426_v16 = vadd.f32 %v1796_v10, %v2928_v40 }
 0x81c   :  { %v2411_v13 = vadd.f32 %v1727_v17, %v2925_v34  ;;  %v2427_v20 = vadd.f32 %v1798_v19, %v2932_v57  ;;  %v1866_v57 = vld [vmem:[%s3202_s4] ss:$0 sm:$0xff] }
 0x81d   :  { %v1805_v32 = vmul.f32 0.5, %v2410_v14 }
 0x81e   :  { %v1809_v35 = vmul.f32 0.5, %v2411_v13  ;;  %v1814_v22 = vmul.f32 0.5, %v2427_v20 }
 0x81f   :  { %2539 = vtanh.f32 %v1805_v32 }
 0x820   :  { %2541 = vtanh.f32 %v1809_v35 }
 0x821   :  { %2543 = vtanh.f32 %v2426_v16 }
 0x822   :  { %2545 = vtanh.f32 %v1814_v22 }
 0x829   :  { %v2540_v23 = vpop.eup %2539 }
 0x82a   :  { %v2542_v38 = vpop.eup %2541  ;;  %v1807_v42 = vmul.f32 0.5, %v2540_v23 }
 0x82b   :  { %v1811_v44 = vmul.f32 0.5, %v2542_v38  ;;  %v2544_v45 = vpop.eup %2543 }
 0x82c   :  { %v1808_v29 = vadd.f32 0.5, %v1807_v42  ;;  %v2546_v52 = vpop.eup %2545 }
 0x82d   :  { %v1812_v47 = vadd.f32 0.5, %v1811_v44  ;;  %v1816_v31 = vmul.f32 0.5, %v2546_v52 }
 0x82e   :  { %v1819_v49 = vmul.f32 %v2544_v45, %v1808_v29 }
 0x82f   :  { %v1818_v34 = vmul.f32 %v1812_v47, %v1652_v41  ;;  %v1817_v40 = vadd.f32 0.5, %v1816_v31 }
 0x831   :  { %v1820_v30 = vadd.f32 %v1819_v49, %v1818_v34 }
 0x833   :  { %2547 = vtanh.f32 %v1820_v30 }
 0x83d   :  { %v2548_v53 = vpop.eup %2547 }
 0x83e   :  { %v1822_v56 = vmul.f32 %v2548_v53, %v1817_v40 }
 0x840   :  { %v1830_v60 = vmul.f32 %v1866_v57, %v1822_v56 }
 0x842   :  { %1831 = vadd.xlane.f32.xlu0 %v1830_v60 }
 0x8cf   :  { %v1832_v63 = vpop.xlane.xlu0 %1831 }
 0x8d0   :  { %v1840_v3 = vadd.f32 %v1867_v62, %v1832_v63 }
 0x8d2   :  { %1842 = vst.msk [vmem:[%s3206_s8] sm:$0xff] %vm1841_vm1, %v1840_v3 }
 0x8d3   :  { %1847 = vsyncpa [#allocation5], 1 }
 0x8d4   :  { %1848 = vsyncpa [#allocation7], 1 }
 0x8d5   :  { %1849 = vsyncpa [#allocation10], 1 }

</bundles_post_ra>
